<compile_context>
chip_gen: v6e
topology: v6e:2x2x1
jax: 0.10.0
libtpu: 0.0.40
codegen_flags: <defaults>
</compile_context>

<pallas_src>
import functools
import math

import jax
import jax.numpy as jnp
from jax import lax
from jax.experimental import pallas as pl
from jax.experimental.pallas import tpu as pltpu


def _layer_norm(x, gamma, beta, eps):
    # torch-layer-normalization semantics: (x - mean) / sqrt(var + eps) * gamma + beta
    # NOTE: eps=1e-16 matches the torch module; a constant row (var==0) would
    # still produce inf/NaN exactly as the reference module does.
    mean = jnp.mean(x, axis=-1, keepdims=True)
    var = jnp.mean(jnp.square(x - mean), axis=-1, keepdims=True)
    return (x - mean) * lax.rsqrt(var + eps) * gamma + beta


def encoder_kernel(x_ref,
                   g1_ref, be1_ref,
                   wqkv_ref, bqkv_ref, wo_ref, bo_ref,
                   g2_ref, be2_ref,
                   w1_ref, b1_ref, w2_ref, b2_ref,
                   o_ref,
                   qkv_scr,
                   *, head_num, q_tile, compute_dtype):
    cd = compute_dtype
    eps = 1e-16

    S, D = x_ref.shape[1], x_ref.shape[2]
    dh = D // head_num
    TQ = q_tile
    qi = pl.program_id(1)
    q0 = pl.multiple_of(qi * TQ, TQ)

    # ---- once per batch row (qi == 0): LN1 + fused Q|K|V projection, cached ----
    # The 1/sqrt(dh) attention scale is folded into wq/bq host-side, so the
    # cached Q rows are already scaled.
    @pl.when(qi == 0)
    def _():
        x = x_ref[0].astype(jnp.float32)                      # (S, D)
        xn = _layer_norm(x, g1_ref[...], be1_ref[...], eps)
        qkv = jnp.dot(xn.astype(cd), wqkv_ref[...],
                      preferred_element_type=jnp.float32) + bqkv_ref[...]
        qkv_scr[...] = qkv.astype(cd)                         # (S, 3D)

    # ---- per q-tile attention (Q/K/V read from the VMEM cache) ----
    qt = qkv_scr[pl.ds(q0, TQ), :D]            # (TQ, D), lane-tile aligned slice
    k = qkv_scr[:, D:2 * D]                    # (S, D)
    v = qkv_scr[:, 2 * D:]                     # (S, D)

    # TODO(synk): attention mask path (mask is always None in this forward) not implemented.
    attn_acc = jnp.zeros((TQ, D), jnp.float32)
    for h in range(head_num):                  # static unroll; head_num is small
        hs, he = h * dh, (h + 1) * dh
        # q @ k^T via dot_general contracting the last axes (no explicit transpose).
        s = lax.dot_general(qt[:, hs:he], k[:, hs:he],
                            (((1,), (1,)), ((), ())),
                            preferred_element_type=jnp.float32)      # (TQ, S)
        m = jnp.max(s, axis=-1, keepdims=True)
        e = jnp.exp(s - m)
        p = e * pl.reciprocal(jnp.sum(e, axis=-1, keepdims=True), approx=False)
        ctx = jnp.dot(p.astype(cd), v[:, hs:he],
                      preferred_element_type=jnp.float32)            # (TQ, dh)
        # Fold the output projection into the head loop:
        #   sum_h ctx_h @ wo[h*dh:(h+1)*dh, :] == concat_h(ctx_h) @ wo
        attn_acc = attn_acc + jnp.dot(ctx.astype(cd), wo_ref[hs:he, :],
                                      preferred_element_type=jnp.float32)

    xq = x_ref[0, pl.ds(q0, TQ), :].astype(jnp.float32)       # residual rows (TQ, D)
    x1 = xq + attn_acc + bo_ref[...]

    # ---- feed-forward block: x1 + FF(LN2(x1)) ----
    x1n = _layer_norm(x1, g2_ref[...], be2_ref[...], eps)
    h1 = jnp.dot(x1n.astype(cd), w1_ref[...],
                 preferred_element_type=jnp.float32) + b1_ref[...]
    h1 = jnp.maximum(h1, 0.0)                                 # ReLU
    ff = jnp.dot(h1.astype(cd), w2_ref[...],
                 preferred_element_type=jnp.float32) + b2_ref[...]

    o_ref[0] = (x1 + ff).astype(o_ref.dtype)


_PARAM_ORDER = ["g1", "be1",
                "wqkv", "bqkv", "wo", "bo",
                "g2", "be2",
                "w1", "b1", "w2", "b2"]
_MATMUL_WEIGHTS = {"wqkv", "wo", "w1", "w2"}


def encoder_component(x, params, head_num, *, q_tile=None,
                      compute_dtype=jnp.float32):
    B, S, D = x.shape
    assert D % head_num == 0, "in_features must be divisible by head_num"
    H = params["w1"].shape[1]
    if q_tile is None:
        q_tile = S if S <= 128 else 128
    assert S % q_tile == 0, "seq length must be divisible by q_tile"
    n_q = S // q_tile

    # Host-side fusion: Q|K|V as one (D, 3D) weight, attention scale folded into Q.
    scale = 1.0 / math.sqrt(D // head_num)
    fused = dict(params)
    fused["wqkv"] = jnp.concatenate(
        [params["wq"] * scale, params["wk"], params["wv"]], axis=1)
    fused["bqkv"] = jnp.concatenate(
        [params["bq"] * scale, params["bk"], params["bv"]], axis=1)

    in_specs = [pl.BlockSpec((1, S, D), lambda b, qi: (b, 0, 0))]
    args = [x]
    for name in _PARAM_ORDER:
        p = fused[name]
        if name in _MATMUL_WEIGHTS:
            # bf16 weights halve DMA bytes / VMEM residency on v6e/v7x;
            # no-op for the f32 path.
            p = p.astype(compute_dtype)
        nd = p.ndim
        in_specs.append(pl.BlockSpec(p.shape, lambda b, qi, _nd=nd: (0,) * _nd))
        args.append(p)

    w_item = jnp.dtype(compute_dtype).itemsize
    flops = B * (2 * S * D * (4 * D + 2 * H) + 4 * S * S * D)
    transcendentals = B * head_num * S * S + 4 * B * S
    bytes_accessed = int(2 * B * S * D * 4
                         + (4 * D * D + 2 * D * H) * w_item
                         + (8 * D + H) * 4)

    kernel = functools.partial(encoder_kernel, head_num=head_num,
                               q_tile=q_tile, compute_dtype=compute_dtype)

    return pl.pallas_call(
        kernel,
        out_shape=jax.ShapeDtypeStruct((B, S, D), x.dtype),
        grid_spec=pltpu.PrefetchScalarGridSpec(
            num_scalar_prefetch=0,
            grid=(B, n_q),
            in_specs=in_specs,
            out_specs=pl.BlockSpec((1, q_tile, D), lambda b, qi: (b, qi, 0)),
            scratch_shapes=[pltpu.VMEM((S, 3 * D), compute_dtype)],
        ),
        compiler_params=pltpu.CompilerParams(
            # Batch axis parallel (megacore); q-tile axis must be sequential so
            # the cached QKV scratch (initialized at qi == 0) stays valid.
            dimension_semantics=("parallel", "arbitrary"),
            vmem_limit_bytes=32 * 1024 * 1024,
        ),
        cost_estimate=pl.CostEstimate(flops=flops,
                                      transcendentals=transcendentals,
                                      bytes_accessed=bytes_accessed),
    )(*args)


def make_params(key, in_features, hidden_features):
    D, H = in_features, hidden_features
    ks = jax.random.split(key, 16)

    def lin(kw, kb, fan_in, fan_out):
        # deterministic synthetic init (roughly PyTorch Linear scale)
        lim = 1.0 / math.sqrt(fan_in)
        w = jax.random.uniform(kw, (fan_in, fan_out), jnp.float32, -lim, lim)
        b = jax.random.uniform(kb, (1, fan_out), jnp.float32, -lim, lim)
        return w, b

    p = {}
    # LayerNorm 1 / 2 (gamma initialized to 1, beta to 0 as in the torch module)
    p["g1"] = jnp.ones((1, D), jnp.float32)
    p["be1"] = jnp.zeros((1, D), jnp.float32)
    p["g2"] = jnp.ones((1, D), jnp.float32)
    p["be2"] = jnp.zeros((1, D), jnp.float32)
    # Multi-head attention projections
    p["wq"], p["bq"] = lin(ks[0], ks[1], D, D)
    p["wk"], p["bk"] = lin(ks[2], ks[3], D, D)
    p["wv"], p["bv"] = lin(ks[4], ks[5], D, D)
    p["wo"], p["bo"] = lin(ks[6], ks[7], D, D)
    # Feed-forward
    p["w1"], p["b1"] = lin(ks[8], ks[9], D, H)
    p["w2"], p["b2"] = lin(ks[10], ks[11], H, D)
    return p


def encoder_reference(x, p, head_num):
    """Pure-JAX reference mirroring the PyTorch module, for verification."""
    eps = 1e-16
    B, S, D = x.shape
    dh = D // head_num

    def ln(y, g, b):
        m = jnp.mean(y, axis=-1, keepdims=True)
        v = jnp.mean((y - m) ** 2, axis=-1, keepdims=True)
        return (y - m) / jnp.sqrt(v + eps) * g + b

    xn = ln(x, p["g1"], p["be1"])
    q = xn @ p["wq"] + p["bq"]
    k = xn @ p["wk"] + p["bk"]
    v = xn @ p["wv"] + p["bv"]

    def split(t):  # (B,S,D) -> (B,h,S,dh)
        return t.reshape(B, S, head_num, dh).transpose(0, 2, 1, 3)

    qh, kh, vh = split(q), split(k), split(v)
    scores = jnp.einsum("bhqd,bhkd->bhqk", qh, kh) / math.sqrt(dh)
    attn = jax.nn.softmax(scores, axis=-1)
    ctx = jnp.einsum("bhqk,bhkd->bhqd", attn, vh).transpose(0, 2, 1, 3).reshape(B, S, D)
    x1 = x + (ctx @ p["wo"] + p["bo"])

    x1n = ln(x1, p["g2"], p["be2"])
    ff = jnp.maximum(x1n @ p["w1"] + p["b1"], 0.0) @ p["w2"] + p["b2"]
    return x1 + ff


if __name__ == "__main__":
    # Small but lane-dense shapes: D multiple of 128, dh = 32.
    B, S, D, H, HEADS = 2, 16, 128, 256, 4

    key = jax.random.PRNGKey(0)
    kx, kp = jax.random.split(key)
    x = jax.random.normal(kx, (B, S, D), dtype=jnp.float32)
    params = make_params(kp, D, H)

    ref = encoder_reference(x, params, HEADS)

    # f32 path (near-exact check against the reference).
    out = encoder_component(x, params, HEADS, q_tile=8,
                            compute_dtype=jnp.float32)
    out = jax.block_until_ready(out)
    assert out.shape == (B, S, D)
    assert jnp.allclose(out, ref, atol=5e-4, rtol=5e-4), "f32 mismatch vs reference"

    # bf16 MXU path (recommended on v6e/v7x); stats/residuals stay f32 in-kernel.
    out_bf16 = encoder_component(x, params, HEADS, q_tile=8,
                                 compute_dtype=jnp.bfloat16)
    out_bf16 = jax.block_until_ready(out_bf16).astype(jnp.float32)
    assert bool(jnp.all(jnp.isfinite(out_bf16)))
    assert float(jnp.max(jnp.abs(out_bf16 - ref))) < 0.5, "bf16 path diverged"

    print("KERNEL_OK")
</pallas_src>

<mosaic_0001>
module attributes {stable_mosaic.version = 11 : i64} {
  func.func @encoder_kernel(%arg0: i32, %arg1: i32, %arg2: memref<1x16x128xf32, #tpu.memory_space<vmem>>, %arg3: memref<1x128xf32, #tpu.memory_space<vmem>>, %arg4: memref<1x128xf32, #tpu.memory_space<vmem>>, %arg5: memref<128x384xf32, #tpu.memory_space<vmem>>, %arg6: memref<1x384xf32, #tpu.memory_space<vmem>>, %arg7: memref<128x128xf32, #tpu.memory_space<vmem>>, %arg8: memref<1x128xf32, #tpu.memory_space<vmem>>, %arg9: memref<1x128xf32, #tpu.memory_space<vmem>>, %arg10: memref<1x128xf32, #tpu.memory_space<vmem>>, %arg11: memref<128x256xf32, #tpu.memory_space<vmem>>, %arg12: memref<1x256xf32, #tpu.memory_space<vmem>>, %arg13: memref<256x128xf32, #tpu.memory_space<vmem>>, %arg14: memref<1x128xf32, #tpu.memory_space<vmem>>, %arg15: memref<1x8x128xf32, #tpu.memory_space<vmem>>, %arg16: memref<16x384xf32, #tpu.memory_space<vmem>>) attributes {dimension_semantics = [#tpu.dimension_semantics<parallel>, #tpu.dimension_semantics<arbitrary>], iteration_bounds = array<i64: 2, 2>, scalar_prefetch = 0 : i64, scratch_operands = 1 : i64, tpu.core_type = #tpu.core_type<tc>, window_params = [{transform_indices = @transform_0, window_bounds = array<i64: 1, 16, 128>}, {pipeline_mode = #tpu.pipeline_mode<synchronous>, transform_indices = @transform_1, window_bounds = array<i64: 1, 128>}, {pipeline_mode = #tpu.pipeline_mode<synchronous>, transform_indices = @transform_2, window_bounds = array<i64: 1, 128>}, {pipeline_mode = #tpu.pipeline_mode<synchronous>, transform_indices = @transform_3, window_bounds = array<i64: 128, 384>}, {pipeline_mode = #tpu.pipeline_mode<synchronous>, transform_indices = @transform_4, window_bounds = array<i64: 1, 384>}, {pipeline_mode = #tpu.pipeline_mode<synchronous>, transform_indices = @transform_5, window_bounds = array<i64: 128, 128>}, {pipeline_mode = #tpu.pipeline_mode<synchronous>, transform_indices = @transform_6, window_bounds = array<i64: 1, 128>}, {pipeline_mode = #tpu.pipeline_mode<synchronous>, transform_indices = @transform_7, window_bounds = array<i64: 1, 128>}, {pipeline_mode = #tpu.pipeline_mode<synchronous>, transform_indices = @transform_8, window_bounds = array<i64: 1, 128>}, {pipeline_mode = #tpu.pipeline_mode<synchronous>, transform_indices = @transform_9, window_bounds = array<i64: 128, 256>}, {pipeline_mode = #tpu.pipeline_mode<synchronous>, transform_indices = @transform_10, window_bounds = array<i64: 1, 256>}, {pipeline_mode = #tpu.pipeline_mode<synchronous>, transform_indices = @transform_11, window_bounds = array<i64: 256, 128>}, {pipeline_mode = #tpu.pipeline_mode<synchronous>, transform_indices = @transform_12, window_bounds = array<i64: 1, 128>}, {transform_indices = @transform_13, window_bounds = array<i64: 1, 8, 128>}]} {
    %c8_i32 = arith.constant 8 : i32
    %0 = arith.muli %arg1, %c8_i32 : i32
    %1 = tpu.assume_multiple %0, 8 : i32
    %c0_i32 = arith.constant 0 : i32
    %2 = arith.cmpi eq, %arg1, %c0_i32 : i32
    %3 = arith.extui %2 : i1 to i32
    %c0_i32_0 = arith.constant 0 : i32
    %4 = arith.cmpi ne, %3, %c0_i32_0 : i32
    scf.if %4 {
      %c0_55 = arith.constant 0 : index
      %c0_56 = arith.constant 0 : index
      %c0_57 = arith.constant 0 : index
      %129 = vector.load %arg2[%c0_55, %c0_56, %c0_57] : memref<1x16x128xf32, #tpu.memory_space<vmem>>, vector<1x16x128xf32>
      %130 = vector.shape_cast %129 : vector<1x16x128xf32> to vector<16x128xf32>
      %c0_58 = arith.constant 0 : index
      %c0_59 = arith.constant 0 : index
      %131 = vector.load %arg3[%c0_58, %c0_59] : memref<1x128xf32, #tpu.memory_space<vmem>>, vector<1x128xf32>
      %c0_60 = arith.constant 0 : index
      %c0_61 = arith.constant 0 : index
      %132 = vector.load %arg4[%c0_60, %c0_61] : memref<1x128xf32, #tpu.memory_space<vmem>>, vector<1x128xf32>
      %cst_62 = arith.constant dense<0.000000e+00> : vector<16xf32>
      %133 = vector.multi_reduction <add>, %130, %cst_62 [1] : vector<16x128xf32> to vector<16xf32>
      %134 = vector.shape_cast %133 : vector<16xf32> to vector<16x1xf32>
      %cst_63 = arith.constant 1.280000e+02 : f32
      %135 = vector.broadcast %cst_63 : f32 to vector<16x1xf32>
      %136 = arith.divf %134, %135 : vector<16x1xf32>
      %137 = vector.broadcast %136 : vector<16x1xf32> to vector<16x128xf32>
      %138 = arith.subf %130, %137 : vector<16x128xf32>
      %139 = arith.mulf %138, %138 : vector<16x128xf32>
      %cst_64 = arith.constant dense<0.000000e+00> : vector<16xf32>
      %140 = vector.multi_reduction <add>, %139, %cst_64 [1] : vector<16x128xf32> to vector<16xf32>
      %141 = vector.shape_cast %140 : vector<16xf32> to vector<16x1xf32>
      %cst_65 = arith.constant 1.280000e+02 : f32
      %142 = vector.broadcast %cst_65 : f32 to vector<16x1xf32>
      %143 = arith.divf %141, %142 : vector<16x1xf32>
      %144 = vector.broadcast %136 : vector<16x1xf32> to vector<16x128xf32>
      %145 = arith.subf %130, %144 : vector<16x128xf32>
      %cst_66 = arith.constant 1.000000e-16 : f32
      %146 = vector.broadcast %cst_66 : f32 to vector<16x1xf32>
      %147 = arith.addf %143, %146 : vector<16x1xf32>
      %148 = math.rsqrt %147 : vector<16x1xf32>
      %149 = vector.broadcast %148 : vector<16x1xf32> to vector<16x128xf32>
      %150 = arith.mulf %145, %149 : vector<16x128xf32>
      %151 = vector.broadcast %131 : vector<1x128xf32> to vector<16x128xf32>
      %152 = arith.mulf %150, %151 : vector<16x128xf32>
      %153 = vector.broadcast %132 : vector<1x128xf32> to vector<16x128xf32>
      %154 = arith.addf %152, %153 : vector<16x128xf32>
      %c0_67 = arith.constant 0 : index
      %c0_68 = arith.constant 0 : index
      %155 = vector.load %arg5[%c0_67, %c0_68] : memref<128x384xf32, #tpu.memory_space<vmem>>, vector<128x384xf32>
      %cst_69 = arith.constant dense<0.000000e+00> : vector<16x384xf32>
      %156 = tpu.matmul %154, %155, %cst_69 {dimension_numbers = #tpu.dot_dimension_numbers<[1], [0], [0], [1], [0, 0, 1, 1], [], []>} : vector<16x128xf32>, vector<128x384xf32>, vector<16x384xf32> -> vector<16x384xf32>
      %c0_70 = arith.constant 0 : index
      %c0_71 = arith.constant 0 : index
      %157 = vector.load %arg6[%c0_70, %c0_71] : memref<1x384xf32, #tpu.memory_space<vmem>>, vector<1x384xf32>
      %158 = vector.broadcast %157 : vector<1x384xf32> to vector<16x384xf32>
      %159 = arith.addf %156, %158 : vector<16x384xf32>
      %c0_72 = arith.constant 0 : index
      %c0_73 = arith.constant 0 : index
      %160 = vector.load %arg16[%c0_72, %c0_73] : memref<16x384xf32, #tpu.memory_space<vmem>>, vector<16x384xf32>
      tpu.vector_store %arg16[%c0_72, %c0_73], %159 {strides = array<i32>} : memref<16x384xf32, #tpu.memory_space<vmem>>, vector<16x384xf32>,
    } else {
    }
    %5 = arith.index_cast %1 : i32 to index
    %c0 = arith.constant 0 : index
    %6 = vector.load %arg16[%5, %c0] : memref<16x384xf32, #tpu.memory_space<vmem>>, vector<8x128xf32>
    %c0_1 = arith.constant 0 : index
    %c128 = arith.constant 128 : index
    %7 = vector.load %arg16[%c0_1, %c128] : memref<16x384xf32, #tpu.memory_space<vmem>>, vector<16x128xf32>
    %c0_2 = arith.constant 0 : index
    %c256 = arith.constant 256 : index
    %8 = vector.load %arg16[%c0_2, %c256] : memref<16x384xf32, #tpu.memory_space<vmem>>, vector<16x128xf32>
    %cst = arith.constant 0.000000e+00 : f32
    %9 = vector.broadcast %cst : f32 to vector<8x128xf32>
    %10 = vector.extract_strided_slice %6 {offsets = [0, 0], sizes = [8, 32], strides = [1, 1]} : vector<8x128xf32> to vector<8x32xf32>
    %11 = vector.extract_strided_slice %7 {offsets = [0, 0], sizes = [16, 32], strides = [1, 1]} : vector<16x128xf32> to vector<16x32xf32>
    %cst_3 = arith.constant dense<0.000000e+00> : vector<8x16xf32>
    %12 = tpu.matmul %10, %11, %cst_3 {dimension_numbers = #tpu.dot_dimension_numbers<[1], [1], [0], [0], [0, 0, 1, 0], [], []>} : vector<8x32xf32>, vector<16x32xf32>, vector<8x16xf32> -> vector<8x16xf32>
    %cst_4 = arith.constant dense<0xFF800000> : vector<8xf32>
    %13 = vector.multi_reduction <maximumf>, %12, %cst_4 [1] : vector<8x16xf32> to vector<8xf32>
    %14 = vector.shape_cast %13 : vector<8xf32> to vector<8x1xf32>
    %15 = vector.broadcast %14 : vector<8x1xf32> to vector<8x16xf32>
    %16 = arith.subf %12, %15 : vector<8x16xf32>
    %17 = math.exp %16 : vector<8x16xf32>
    %cst_5 = arith.constant dense<0.000000e+00> : vector<8xf32>
    %18 = vector.multi_reduction <add>, %17, %cst_5 [1] : vector<8x16xf32> to vector<8xf32>
    %19 = vector.shape_cast %18 : vector<8xf32> to vector<8x1xf32>
    %20 = tpu.reciprocal %19 : vector<8x1xf32> -> vector<8x1xf32>
    %21 = vector.broadcast %20 : vector<8x1xf32> to vector<8x16xf32>
    %22 = arith.mulf %17, %21 : vector<8x16xf32>
    %23 = vector.extract_strided_slice %8 {offsets = [0, 0], sizes = [16, 32], strides = [1, 1]} : vector<16x128xf32> to vector<16x32xf32>
    %cst_6 = arith.constant dense<0.000000e+00> : vector<8x32xf32>
    %24 = tpu.matmul %22, %23, %cst_6 {dimension_numbers = #tpu.dot_dimension_numbers<[1], [0], [0], [1], [0, 0, 1, 1], [], []>} : vector<8x16xf32>, vector<16x32xf32>, vector<8x32xf32> -> vector<8x32xf32>
    %c0_7 = arith.constant 0 : index
    %c0_8 = arith.constant 0 : index
    %25 = vector.load %arg7[%c0_7, %c0_8] : memref<128x128xf32, #tpu.memory_space<vmem>>, vector<32x128xf32>
    %cst_9 = arith.constant dense<0.000000e+00> : vector<8x128xf32>
    %26 = tpu.matmul %24, %25, %cst_9 {dimension_numbers = #tpu.dot_dimension_numbers<[1], [0], [0], [1], [0, 0, 1, 1], [], []>} : vector<8x32xf32>, vector<32x128xf32>, vector<8x128xf32> -> vector<8x128xf32>
    %27 = arith.addf %9, %26 : vector<8x128xf32>
    %28 = vector.extract_strided_slice %6 {offsets = [0, 32], sizes = [8, 32], strides = [1, 1]} : vector<8x128xf32> to vector<8x32xf32>
    %29 = vector.extract_strided_slice %7 {offsets = [0, 32], sizes = [16, 32], strides = [1, 1]} : vector<16x128xf32> to vector<16x32xf32>
    %cst_10 = arith.constant dense<0.000000e+00> : vector<8x16xf32>
    %30 = tpu.matmul %28, %29, %cst_10 {dimension_numbers = #tpu.dot_dimension_numbers<[1], [1], [0], [0], [0, 0, 1, 0], [], []>} : vector<8x32xf32>, vector<16x32xf32>, vector<8x16xf32> -> vector<8x16xf32>
    %cst_11 = arith.constant dense<0xFF800000> : vector<8xf32>
    %31 = vector.multi_reduction <maximumf>, %30, %cst_11 [1] : vector<8x16xf32> to vector<8xf32>
    %32 = vector.shape_cast %31 : vector<8xf32> to vector<8x1xf32>
    %33 = vector.broadcast %32 : vector<8x1xf32> to vector<8x16xf32>
    %34 = arith.subf %30, %33 : vector<8x16xf32>
    %35 = math.exp %34 : vector<8x16xf32>
    %cst_12 = arith.constant dense<0.000000e+00> : vector<8xf32>
    %36 = vector.multi_reduction <add>, %35, %cst_12 [1] : vector<8x16xf32> to vector<8xf32>
    %37 = vector.shape_cast %36 : vector<8xf32> to vector<8x1xf32>
    %38 = tpu.reciprocal %37 : vector<8x1xf32> -> vector<8x1xf32>
    %39 = vector.broadcast %38 : vector<8x1xf32> to vector<8x16xf32>
    %40 = arith.mulf %35, %39 : vector<8x16xf32>
    %41 = vector.extract_strided_slice %8 {offsets = [0, 32], sizes = [16, 32], strides = [1, 1]} : vector<16x128xf32> to vector<16x32xf32>
    %cst_13 = arith.constant dense<0.000000e+00> : vector<8x32xf32>
    %42 = tpu.matmul %40, %41, %cst_13 {dimension_numbers = #tpu.dot_dimension_numbers<[1], [0], [0], [1], [0, 0, 1, 1], [], []>} : vector<8x16xf32>, vector<16x32xf32>, vector<8x32xf32> -> vector<8x32xf32>
    %c32 = arith.constant 32 : index
    %c0_14 = arith.constant 0 : index
    %43 = vector.load %arg7[%c32, %c0_14] : memref<128x128xf32, #tpu.memory_space<vmem>>, vector<32x128xf32>
    %cst_15 = arith.constant dense<0.000000e+00> : vector<8x128xf32>
    %44 = tpu.matmul %42, %43, %cst_15 {dimension_numbers = #tpu.dot_dimension_numbers<[1], [0], [0], [1], [0, 0, 1, 1], [], []>} : vector<8x32xf32>, vector<32x128xf32>, vector<8x128xf32> -> vector<8x128xf32>
    %45 = arith.addf %27, %44 : vector<8x128xf32>
    %46 = vector.extract_strided_slice %6 {offsets = [0, 64], sizes = [8, 32], strides = [1, 1]} : vector<8x128xf32> to vector<8x32xf32>
    %47 = vector.extract_strided_slice %7 {offsets = [0, 64], sizes = [16, 32], strides = [1, 1]} : vector<16x128xf32> to vector<16x32xf32>
    %cst_16 = arith.constant dense<0.000000e+00> : vector<8x16xf32>
    %48 = tpu.matmul %46, %47, %cst_16 {dimension_numbers = #tpu.dot_dimension_numbers<[1], [1], [0], [0], [0, 0, 1, 0], [], []>} : vector<8x32xf32>, vector<16x32xf32>, vector<8x16xf32> -> vector<8x16xf32>
    %cst_17 = arith.constant dense<0xFF800000> : vector<8xf32>
    %49 = vector.multi_reduction <maximumf>, %48, %cst_17 [1] : vector<8x16xf32> to vector<8xf32>
    %50 = vector.shape_cast %49 : vector<8xf32> to vector<8x1xf32>
    %51 = vector.broadcast %50 : vector<8x1xf32> to vector<8x16xf32>
    %52 = arith.subf %48, %51 : vector<8x16xf32>
    %53 = math.exp %52 : vector<8x16xf32>
    %cst_18 = arith.constant dense<0.000000e+00> : vector<8xf32>
    %54 = vector.multi_reduction <add>, %53, %cst_18 [1] : vector<8x16xf32> to vector<8xf32>
    %55 = vector.shape_cast %54 : vector<8xf32> to vector<8x1xf32>
    %56 = tpu.reciprocal %55 : vector<8x1xf32> -> vector<8x1xf32>
    %57 = vector.broadcast %56 : vector<8x1xf32> to vector<8x16xf32>
    %58 = arith.mulf %53, %57 : vector<8x16xf32>
    %59 = vector.extract_strided_slice %8 {offsets = [0, 64], sizes = [16, 32], strides = [1, 1]} : vector<16x128xf32> to vector<16x32xf32>
    %cst_19 = arith.constant dense<0.000000e+00> : vector<8x32xf32>
    %60 = tpu.matmul %58, %59, %cst_19 {dimension_numbers = #tpu.dot_dimension_numbers<[1], [0], [0], [1], [0, 0, 1, 1], [], []>} : vector<8x16xf32>, vector<16x32xf32>, vector<8x32xf32> -> vector<8x32xf32>
    %c64 = arith.constant 64 : index
    %c0_20 = arith.constant 0 : index
    %61 = vector.load %arg7[%c64, %c0_20] : memref<128x128xf32, #tpu.memory_space<vmem>>, vector<32x128xf32>
    %cst_21 = arith.constant dense<0.000000e+00> : vector<8x128xf32>
    %62 = tpu.matmul %60, %61, %cst_21 {dimension_numbers = #tpu.dot_dimension_numbers<[1], [0], [0], [1], [0, 0, 1, 1], [], []>} : vector<8x32xf32>, vector<32x128xf32>, vector<8x128xf32> -> vector<8x128xf32>
    %63 = arith.addf %45, %62 : vector<8x128xf32>
    %64 = vector.extract_strided_slice %6 {offsets = [0, 96], sizes = [8, 32], strides = [1, 1]} : vector<8x128xf32> to vector<8x32xf32>
    %65 = vector.extract_strided_slice %7 {offsets = [0, 96], sizes = [16, 32], strides = [1, 1]} : vector<16x128xf32> to vector<16x32xf32>
    %cst_22 = arith.constant dense<0.000000e+00> : vector<8x16xf32>
    %66 = tpu.matmul %64, %65, %cst_22 {dimension_numbers = #tpu.dot_dimension_numbers<[1], [1], [0], [0], [0, 0, 1, 0], [], []>} : vector<8x32xf32>, vector<16x32xf32>, vector<8x16xf32> -> vector<8x16xf32>
    %cst_23 = arith.constant dense<0xFF800000> : vector<8xf32>
    %67 = vector.multi_reduction <maximumf>, %66, %cst_23 [1] : vector<8x16xf32> to vector<8xf32>
    %68 = vector.shape_cast %67 : vector<8xf32> to vector<8x1xf32>
    %69 = vector.broadcast %68 : vector<8x1xf32> to vector<8x16xf32>
    %70 = arith.subf %66, %69 : vector<8x16xf32>
    %71 = math.exp %70 : vector<8x16xf32>
    %cst_24 = arith.constant dense<0.000000e+00> : vector<8xf32>
    %72 = vector.multi_reduction <add>, %71, %cst_24 [1] : vector<8x16xf32> to vector<8xf32>
    %73 = vector.shape_cast %72 : vector<8xf32> to vector<8x1xf32>
    %74 = tpu.reciprocal %73 : vector<8x1xf32> -> vector<8x1xf32>
    %75 = vector.broadcast %74 : vector<8x1xf32> to vector<8x16xf32>
    %76 = arith.mulf %71, %75 : vector<8x16xf32>
    %77 = vector.extract_strided_slice %8 {offsets = [0, 96], sizes = [16, 32], strides = [1, 1]} : vector<16x128xf32> to vector<16x32xf32>
    %cst_25 = arith.constant dense<0.000000e+00> : vector<8x32xf32>
    %78 = tpu.matmul %76, %77, %cst_25 {dimension_numbers = #tpu.dot_dimension_numbers<[1], [0], [0], [1], [0, 0, 1, 1], [], []>} : vector<8x16xf32>, vector<16x32xf32>, vector<8x32xf32> -> vector<8x32xf32>
    %c96 = arith.constant 96 : index
    %c0_26 = arith.constant 0 : index
    %79 = vector.load %arg7[%c96, %c0_26] : memref<128x128xf32, #tpu.memory_space<vmem>>, vector<32x128xf32>
    %cst_27 = arith.constant dense<0.000000e+00> : vector<8x128xf32>
    %80 = tpu.matmul %78, %79, %cst_27 {dimension_numbers = #tpu.dot_dimension_numbers<[1], [0], [0], [1], [0, 0, 1, 1], [], []>} : vector<8x32xf32>, vector<32x128xf32>, vector<8x128xf32> -> vector<8x128xf32>
    %81 = arith.addf %63, %80 : vector<8x128xf32>
    %c0_28 = arith.constant 0 : index
    %82 = arith.index_cast %1 : i32 to index
    %c0_29 = arith.constant 0 : index
    %83 = vector.load %arg2[%c0_28, %82, %c0_29] : memref<1x16x128xf32, #tpu.memory_space<vmem>>, vector<1x8x128xf32>
    %84 = vector.shape_cast %83 : vector<1x8x128xf32> to vector<8x128xf32>
    %85 = arith.addf %84, %81 : vector<8x128xf32>
    %c0_30 = arith.constant 0 : index
    %c0_31 = arith.constant 0 : index
    %86 = vector.load %arg8[%c0_30, %c0_31] : memref<1x128xf32, #tpu.memory_space<vmem>>, vector<1x128xf32>
    %87 = vector.broadcast %86 : vector<1x128xf32> to vector<8x128xf32>
    %88 = arith.addf %85, %87 : vector<8x128xf32>
    %c0_32 = arith.constant 0 : index
    %c0_33 = arith.constant 0 : index
    %89 = vector.load %arg9[%c0_32, %c0_33] : memref<1x128xf32, #tpu.memory_space<vmem>>, vector<1x128xf32>
    %c0_34 = arith.constant 0 : index
    %c0_35 = arith.constant 0 : index
    %90 = vector.load %arg10[%c0_34, %c0_35] : memref<1x128xf32, #tpu.memory_space<vmem>>, vector<1x128xf32>
    %cst_36 = arith.constant dense<0.000000e+00> : vector<8xf32>
    %91 = vector.multi_reduction <add>, %88, %cst_36 [1] : vector<8x128xf32> to vector<8xf32>
    %92 = vector.shape_cast %91 : vector<8xf32> to vector<8x1xf32>
    %cst_37 = arith.constant 1.280000e+02 : f32
    %93 = vector.broadcast %cst_37 : f32 to vector<8x1xf32>
    %94 = arith.divf %92, %93 : vector<8x1xf32>
    %95 = vector.broadcast %94 : vector<8x1xf32> to vector<8x128xf32>
    %96 = arith.subf %88, %95 : vector<8x128xf32>
    %97 = arith.mulf %96, %96 : vector<8x128xf32>
    %cst_38 = arith.constant dense<0.000000e+00> : vector<8xf32>
    %98 = vector.multi_reduction <add>, %97, %cst_38 [1] : vector<8x128xf32> to vector<8xf32>
    %99 = vector.shape_cast %98 : vector<8xf32> to vector<8x1xf32>
    %cst_39 = arith.constant 1.280000e+02 : f32
    %100 = vector.broadcast %cst_39 : f32 to vector<8x1xf32>
    %101 = arith.divf %99, %100 : vector<8x1xf32>
    %102 = vector.broadcast %94 : vector<8x1xf32> to vector<8x128xf32>
    %103 = arith.subf %88, %102 : vector<8x128xf32>
    %cst_40 = arith.constant 1.000000e-16 : f32
    %104 = vector.broadcast %cst_40 : f32 to vector<8x1xf32>
    %105 = arith.addf %101, %104 : vector<8x1xf32>
    %106 = math.rsqrt %105 : vector<8x1xf32>
    %107 = vector.broadcast %106 : vector<8x1xf32> to vector<8x128xf32>
    %108 = arith.mulf %103, %107 : vector<8x128xf32>
    %109 = vector.broadcast %89 : vector<1x128xf32> to vector<8x128xf32>
    %110 = arith.mulf %108, %109 : vector<8x128xf32>
    %111 = vector.broadcast %90 : vector<1x128xf32> to vector<8x128xf32>
    %112 = arith.addf %110, %111 : vector<8x128xf32>
    %c0_41 = arith.constant 0 : index
    %c0_42 = arith.constant 0 : index
    %113 = vector.load %arg11[%c0_41, %c0_42] : memref<128x256xf32, #tpu.memory_space<vmem>>, vector<128x256xf32>
    %cst_43 = arith.constant dense<0.000000e+00> : vector<8x256xf32>
    %114 = tpu.matmul %112, %113, %cst_43 {dimension_numbers = #tpu.dot_dimension_numbers<[1], [0], [0], [1], [0, 0, 1, 1], [], []>} : vector<8x128xf32>, vector<128x256xf32>, vector<8x256xf32> -> vector<8x256xf32>
    %c0_44 = arith.constant 0 : index
    %c0_45 = arith.constant 0 : index
    %115 = vector.load %arg12[%c0_44, %c0_45] : memref<1x256xf32, #tpu.memory_space<vmem>>, vector<1x256xf32>
    %116 = vector.broadcast %115 : vector<1x256xf32> to vector<8x256xf32>
    %117 = arith.addf %114, %116 : vector<8x256xf32>
    %cst_46 = arith.constant 0.000000e+00 : f32
    %118 = vector.broadcast %cst_46 : f32 to vector<8x256xf32>
    %119 = arith.maximumf %117, %118 : vector<8x256xf32>
    %c0_47 = arith.constant 0 : index
    %c0_48 = arith.constant 0 : index
    %120 = vector.load %arg13[%c0_47, %c0_48] : memref<256x128xf32, #tpu.memory_space<vmem>>, vector<256x128xf32>
    %cst_49 = arith.constant dense<0.000000e+00> : vector<8x128xf32>
    %121 = tpu.matmul %119, %120, %cst_49 {dimension_numbers = #tpu.dot_dimension_numbers<[1], [0], [0], [1], [0, 0, 1, 1], [], []>} : vector<8x256xf32>, vector<256x128xf32>, vector<8x128xf32> -> vector<8x128xf32>
    %c0_50 = arith.constant 0 : index
    %c0_51 = arith.constant 0 : index
    %122 = vector.load %arg14[%c0_50, %c0_51] : memref<1x128xf32, #tpu.memory_space<vmem>>, vector<1x128xf32>
    %123 = vector.broadcast %122 : vector<1x128xf32> to vector<8x128xf32>
    %124 = arith.addf %121, %123 : vector<8x128xf32>
    %125 = arith.addf %88, %124 : vector<8x128xf32>
    %c0_52 = arith.constant 0 : index
    %c0_53 = arith.constant 0 : index
    %c0_54 = arith.constant 0 : index
    %126 = vector.load %arg15[%c0_52, %c0_53, %c0_54] : memref<1x8x128xf32, #tpu.memory_space<vmem>>, vector<1x8x128xf32>
    %127 = vector.shape_cast %126 : vector<1x8x128xf32> to vector<8x128xf32>
    %128 = vector.shape_cast %125 : vector<8x128xf32> to vector<1x8x128xf32>
    tpu.vector_store %arg15[%c0_52, %c0_53, %c0_54], %128 {strides = array<i32>} : memref<1x8x128xf32, #tpu.memory_space<vmem>>, vector<1x8x128xf32>,
    return
  }
  func.func @transform_0(%arg0: i32, %arg1: i32) -> (i32, i32, i32) {
    %c0_i32 = arith.constant 0 : i32
    %c0_i32_0 = arith.constant 0 : i32
    %c0_i32_1 = arith.constant 0 : i32
    return %arg0, %c0_i32, %c0_i32_0 : i32, i32, i32
  }
  func.func @transform_1(%arg0: i32, %arg1: i32) -> (i32, i32) {
    %c0_i32 = arith.constant 0 : i32
    %c0_i32_0 = arith.constant 0 : i32
    %c0_i32_1 = arith.constant 0 : i32
    return %c0_i32, %c0_i32_0 : i32, i32
  }
  func.func @transform_2(%arg0: i32, %arg1: i32) -> (i32, i32) {
    %c0_i32 = arith.constant 0 : i32
    %c0_i32_0 = arith.constant 0 : i32
    %c0_i32_1 = arith.constant 0 : i32
    return %c0_i32, %c0_i32_0 : i32, i32
  }
  func.func @transform_3(%arg0: i32, %arg1: i32) -> (i32, i32) {
    %c0_i32 = arith.constant 0 : i32
    %c0_i32_0 = arith.constant 0 : i32
    %c0_i32_1 = arith.constant 0 : i32
    return %c0_i32, %c0_i32_0 : i32, i32
  }
  func.func @transform_4(%arg0: i32, %arg1: i32) -> (i32, i32) {
    %c0_i32 = arith.constant 0 : i32
    %c0_i32_0 = arith.constant 0 : i32
    %c0_i32_1 = arith.constant 0 : i32
    return %c0_i32, %c0_i32_0 : i32, i32
  }
  func.func @transform_5(%arg0: i32, %arg1: i32) -> (i32, i32) {
    %c0_i32 = arith.constant 0 : i32
    %c0_i32_0 = arith.constant 0 : i32
    %c0_i32_1 = arith.constant 0 : i32
    return %c0_i32, %c0_i32_0 : i32, i32
  }
  func.func @transform_6(%arg0: i32, %arg1: i32) -> (i32, i32) {
    %c0_i32 = arith.constant 0 : i32
    %c0_i32_0 = arith.constant 0 : i32
    %c0_i32_1 = arith.constant 0 : i32
    return %c0_i32, %c0_i32_0 : i32, i32
  }
  func.func @transform_7(%arg0: i32, %arg1: i32) -> (i32, i32) {
    %c0_i32 = arith.constant 0 : i32
    %c0_i32_0 = arith.constant 0 : i32
    %c0_i32_1 = arith.constant 0 : i32
    return %c0_i32, %c0_i32_0 : i32, i32
  }
  func.func @transform_8(%arg0: i32, %arg1: i32) -> (i32, i32) {
    %c0_i32 = arith.constant 0 : i32
    %c0_i32_0 = arith.constant 0 : i32
    %c0_i32_1 = arith.constant 0 : i32
    return %c0_i32, %c0_i32_0 : i32, i32
  }
  func.func @transform_9(%arg0: i32, %arg1: i32) -> (i32, i32) {
    %c0_i32 = arith.constant 0 : i32
    %c0_i32_0 = arith.constant 0 : i32
    %c0_i32_1 = arith.constant 0 : i32
    return %c0_i32, %c0_i32_0 : i32, i32
  }
  func.func @transform_10(%arg0: i32, %arg1: i32) -> (i32, i32) {
    %c0_i32 = arith.constant 0 : i32
    %c0_i32_0 = arith.constant 0 : i32
    %c0_i32_1 = arith.constant 0 : i32
    return %c0_i32, %c0_i32_0 : i32, i32
  }
  func.func @transform_11(%arg0: i32, %arg1: i32) -> (i32, i32) {
    %c0_i32 = arith.constant 0 : i32
    %c0_i32_0 = arith.constant 0 : i32
    %c0_i32_1 = arith.constant 0 : i32
    return %c0_i32, %c0_i32_0 : i32, i32
  }
  func.func @transform_12(%arg0: i32, %arg1: i32) -> (i32, i32) {
    %c0_i32 = arith.constant 0 : i32
    %c0_i32_0 = arith.constant 0 : i32
    %c0_i32_1 = arith.constant 0 : i32
    return %c0_i32, %c0_i32_0 : i32, i32
  }
  func.func @transform_13(%arg0: i32, %arg1: i32) -> (i32, i32, i32) {
    %c0_i32 = arith.constant 0 : i32
    %c0_i32_0 = arith.constant 0 : i32
    return %arg0, %arg1, %c0_i32 : i32, i32, i32
  }
}

</mosaic_0001>

<bundles_post_ra>
// kernel: tpu_custom_call.1
= control target key start
LH: loop header
LB: loop body
LE: loop exit
PB: predicated region body
PF: predicated region fallthrough
CT: control target
= control target key end

     0   :  { %s3629_s0 = inlined_call_operand.hbm [shape: f32[2,16,128], index: 0, kind: input, shape index: {}]   ;;  %s3630_s1 = inlined_call_operand.hbm [shape: f32[1,128], index: 1, kind: input, shape index: {}]   ;;  %s3631_s2 = inlined_call_operand.hbm [shape: f32[1,128], index: 2, kind: input, shape index: {}]   ;;  %s3632_s3 = inlined_call_operand.hbm [shape: f32[128,384], index: 3, kind: input, shape index: {}]   ;;  %s3633_s4 = inlined_call_operand.vmem [shape: f32[1,384], index: 4, kind: input, shape index: {}]   ;;  %s3634_s5 = inlined_call_operand.hbm [shape: f32[128,128], index: 5, kind: input, shape index: {}]   ;;  %s3635_s6 = inlined_call_operand.vmem [shape: f32[1,128], index: 6, kind: input, shape index: {}]   ;;  %s3636_s7 = inlined_call_operand.vmem [shape: f32[1,128], index: 7, kind: input, shape index: {}]   ;;  %s3637_s8 = inlined_call_operand.vmem [shape: f32[1,128], index: 8, kind: input, shape index: {}]   ;;  %s3638_s9 = inlined_call_operand.hbm [shape: f32[128,256], index: 9, kind: input, shape index: {}]   ;;  %s3639_s10 = inlined_call_operand.vmem [shape: f32[1,256], index: 10, kind: input, shape index: {}]   ;;  %s3640_s11 = inlined_call_operand.hbm [shape: f32[256,128], index: 11, kind: input, shape index: {}]   ;;  %s3641_s12 = inlined_call_operand.vmem [shape: f32[1,128], index: 12, kind: input, shape index: {}]   ;;  %s3642_s13 = inlined_call_operand.hbm [shape: f32[2,16,128], index: 13, kind: output, shape index: {}]  }
   0x1   :  { %3652 = sst [smem:[#allocation24_spill]] %s3630_s1 }
   0x2   :  { %3653 = sst [smem:[#allocation25_spill]] %s3631_s2 }
   0x3   :  { %3654 = sst [smem:[#allocation26_spill]] %s3632_s3 }
   0x4   :  { %3655 = sst [smem:[#allocation27_spill]] %s3633_s4 }
   0x5   :  { %3656 = sst [smem:[#allocation28_spill]] %s3634_s5 }
   0x6   :  { %3657 = sst [smem:[#allocation29_spill]] %s3635_s6 }
   0x7   :  { %3658 = sst [smem:[#allocation30_spill]] %s3636_s7 }
   0x8   :  { %3659 = sst [smem:[#allocation31_spill]] %s3637_s8 }
   0x9   :  { %3660 = sst [smem:[#allocation32_spill]] %s3638_s9 }
   0xa   :  { %3661 = sst [smem:[#allocation33_spill]] %s3639_s10 }
   0xb   :  { %3662 = sst [smem:[#allocation34_spill]] %s3640_s11 }
   0xc   :  { %3663 = sst [smem:[#allocation35_spill]] %s3641_s12 }
   0xd   :  { %3664 = sst [smem:[#allocation36_spill]] %s3642_s13 }
   0xe   :  { %18 = vsyncpa [#allocation4], 0 }
   0xf   :  { %20 = vsyncpa [#allocation4 + $0x1], 0 }
  0x10   :  { %21 = vsyncpa [#allocation7], 0 }
  0x11   :  { %22 = vsyncpa [#allocation10], 0 }
  0x12   :  { %23 = vsyncpa [#allocation13], 0 }
  0x13   :  { %24 = vsyncpa [#allocation5], 0 }
  0x14   :  { %26 = vsyncpa [#allocation5 + $0x1], 0  ;;  %s3152_s25 = smov 0   ;;  %s3154_s26 = smov 0  }
  0x15   :  { %s3156_s27 = smov 0   ;;  %s3158_s28 = smov 0  }
  0x16   :  { %s3160_s29 = smov 0   ;;  %s3162_s30 = smov 0  }
  0x17   :  { %s3164_s14 = smov 0   ;;  %s3166_s15 = smov 0  }
  0x18   :  { %s3168_s16 = smov 0   ;;  %s3170_s17 = smov 0  }
  0x19   :  { %s3172_s18 = smov 0  }
  0x1a LB: > { %3665 = sst [smem:[#allocation21_spill]] %s3044_s14  ;;  %s2257_s19 = sadd.s32 4294967295, %s3060_s18   ;;  %s3060_s18 = sphi %s3172_s18, %s32_s18   ;;  %s3056_s17 = sphi %s3170_s17, %s3710_s17   ;;  %s3052_s16 = sphi %s3168_s16, %s3709_s16   ;;  %s3048_s15 = sphi %s3166_s15, %s3708_s15   ;;  %s3044_s14 = sphi %s3164_s14, %s3707_s14   ;;  %s3040_s30 = sphi %s3162_s30, %s3706_s30   ;;  %s3036_s29 = sphi %s3160_s29, %s3705_s29   ;;  %s3032_s28 = sphi %s3158_s28, %s3704_s28   ;;  %s3028_s27 = sphi %s3156_s27, %s3703_s27   ;;  %s3024_s26 = sphi %s3154_s26, %s3702_s26   ;;  %s3020_s25 = sphi %s3152_s25, %s3701_s25  }
  0x1b   : > { %3666 = sst [smem:[#allocation22_spill]] %s3048_s15  ;;  %p2259_p0 = scmp.ge.s32.totalorder %s3060_s18, 1 }
  0x1c   : > { %p3209_p1 = scmp.eq.s32.totalorder %s2257_s19, 0  ;;  %p3213_p2 = scmp.eq.s32.totalorder %s2257_s19, 3 }
  0x1d   : > { %p355_p3 = scmp.lt.s32.totalorder %s3060_s18, 5  ;;  %s3062_s23 = smov [#allocation6]  }
  0x1e   : > { %s3667_s20 = scalar_select %p3209_p1, 1, 0 }
  0x1f   : > { %s3668_s21 = scalar_select %p3213_p2, 1, 0 }
  0x20   : > { %p3218_p4 = pnand %p2259_p0, %p355_p3  ;;  %s368_s24 = sshll.u32 %s3062_s23, 4  ;;  %s369_s24 = int_to_ptr.vmem [resolvable:$true] %s368_s24 }
  0x21   : > { %s3063_s13 = smov [#allocation9]   ;;  %s3064_s10 = smov [#allocation12]  }
  0x22   : > { %s3669_s22 = scalar_select %p3218_p4, 1, 0 }
  0x23   : > { %p2575_p5 = pneg %p3218_p4  ;;  %s389_s12 = sshll.u32 %s3063_s13, 4  ;;  %s3224_s12 = int_to_ptr.vmem [resolvable:$true] %s389_s12 }
  0x24   : > { %s427_s15 = sshll.u32 %s3064_s10, 4  ;;  %s2755_s23 = scalar_lea.vmem %s369_s24, 16  ;;  %s428_s15 = int_to_ptr.vmem [resolvable:$true] %s427_s15 }
  0x25   : > { %p3228_p6 = pnand %p2575_p5, %p3209_p1  ;;  %p2756_p8 = scmp.ne.s32.totalorder %s369_s24, %s2755_s23 }
  0x26   : > { %s2762_s13 = scalar_lea.vmem %s369_s24, 32  ;;  %p2763_p11 = scmp.lt.s32.totalorder %s369_s24, %s369_s24 }
  0x27   : > { %p3234_p7 = pneg %p3228_p6  ;;  %p2764_p12 = scmp.lt.s32.totalorder %s2762_s13, %s2755_s23 }
  0x29   : > { %p2758_p9 = pnand %p2756_p8, %p3234_p7  ;;  %p2765_p13 = por %p2764_p12, %p2763_p11 }
  0x2b   : > { %p2759_p10 = pneg %p2758_p9 }
  0x2d   : > { %p2766_p0 = pnand %p2765_p13, %p2759_p10 }
  0x2f   : > { %2769 = shalt.err (!%p2766_p0)
}
  0x30   : > { %s3672_s1 = sld [smem:[#allocation24_spill]]  ;;  %s2781_s6 = scalar_lea.vmem %s3224_s12, 6144 }
  0x31   : > { %p2782_p3 = scmp.ne.s32.totalorder %s3224_s12, %s2781_s6  ;;  %p2789_p9 = scmp.lt.s32.totalorder %s3224_s12, %s3224_s12 }
  0x32   : > { %p2790_p11 = scmp.lt.s32.totalorder %s2781_s6, %s2781_s6 }
  0x33   : > { %p2784_p5 = pnand %p2782_p3, %p3234_p7 }
  0x34   : > { %p2791_p10 = por %p2790_p11, %p2789_p9 }
  0x35   : > { %p2785_p8 = pneg %p2784_p5 }
  0x36   : > { %2578 = dma.hbm_to_vmem [thread:$0]  (!%p3228_p6), %s3672_s1, 16, %s369_s24, [#allocation7]  }
  0x37   : > { %p2792_p12 = pnand %p2791_p10, %p2785_p8 }
  0x39   : > { %2795 = shalt.err (!%p2792_p12)
}
  0x3a   : > { %s3065_s23 = smov 384   ;;  %s3066_s7 = smov 24  }
  0x3b   : > { %s3673_s3 = sld [smem:[#allocation26_spill]]  ;;  %s2807_s24 = scalar_lea.vmem %s428_s15, 4096 }
  0x3c   : > { %p2808_p13 = scmp.ne.s32.totalorder %s428_s15, %s2807_s24  ;;  %p2815_p5 = scmp.lt.s32.totalorder %s428_s15, %s428_s15 }
  0x3d   : > { %p2816_p9 = scmp.lt.s32.totalorder %s2807_s24, %s2807_s24 }
  0x3e   : > { %p2810_p0 = pnand %p2808_p13, %p3234_p7 }
  0x3f   : > { %p2817_p8 = por %p2816_p9, %p2815_p5 }
  0x40   : > { %p2811_p3 = pneg %p2810_p0 }
  0x41   : > { %2584 = dma.hbm_to_vmem [thread:$0]  (!%p3228_p6), %s3673_s3, 6144, %s3224_s12, [#allocation10], %s3065_s23, %s3065_s23, %s3066_s7  }
  0x42   : > { %p2818_p11 = pnand %p2817_p8, %p2811_p3 }
  0x44   : > { %2821 = shalt.err (!%p2818_p11)
}
  0x45   : > { %s3067_s6 = smov 256   ;;  %s3068_s1 = smov 16  }
  0x46   : > { %s3674_s9 = sld [smem:[#allocation32_spill]]  ;;  %s3069_s12 = smov [#allocation8]  }
  0x47   : > { %s379_s23 = sshll.u32 %s3069_s12, 4  ;;  %s3070_s7 = smov [#allocation11]   ;;  %s380_s23 = int_to_ptr.vmem [resolvable:$true] %s379_s23 }
  0x48   : > { %s405_s13 = sshll.u32 %s3070_s7, 4  ;;  %s2833_s10 = scalar_lea.vmem %s380_s23, 16  ;;  %s406_s13 = int_to_ptr.vmem [resolvable:$true] %s405_s13 }
  0x49   : > { %p2834_p10 = scmp.ne.s32.totalorder %s380_s23, %s2833_s10  ;;  %s2840_s24 = scalar_lea.vmem %s380_s23, 32 }
  0x4a   : > { %p2841_p0 = scmp.lt.s32.totalorder %s380_s23, %s380_s23  ;;  %p2842_p3 = scmp.lt.s32.totalorder %s2840_s24, %s2833_s10 }
  0x4b   : > { %p2836_p12 = pnand %p2834_p10, %p3234_p7 }
  0x4c   : > { %2590 = dma.hbm_to_vmem [thread:$0]  (!%p3228_p6), %s3674_s9, 4096, %s428_s15, [#allocation13], %s3067_s6, %s3067_s6, %s3068_s1  }
  0x4d   : > { %p2837_p13 = pneg %p2836_p12  ;;  %p2843_p5 = por %p2842_p3, %p2841_p0 }
  0x4f   : > { %p2844_p9 = pnand %p2843_p5, %p2837_p13 }
  0x51   : > { %2847 = shalt.err (!%p2844_p9)
}
  0x52   : > { %s3675_s2 = sld [smem:[#allocation25_spill]]  ;;  %s2859_s14 = scalar_lea.vmem %s406_s13, 2048 }
  0x53   : > { %p2860_p8 = scmp.ne.s32.totalorder %s406_s13, %s2859_s14  ;;  %p2867_p10 = scmp.lt.s32.totalorder %s406_s13, %s406_s13 }
  0x54   : > { %p2868_p12 = scmp.lt.s32.totalorder %s2859_s14, %s2859_s14 }
  0x55   : > { %p2862_p11 = pnand %p2860_p8, %p3234_p7 }
  0x56   : > { %p2869_p2 = por %p2868_p12, %p2867_p10 }
  0x57   : > { %p2863_p4 = pneg %p2862_p11 }
  0x58   : > { %2581 = dma.hbm_to_vmem [thread:$0]  (!%p3228_p6), %s3675_s2, 16, %s380_s23, [#allocation7]  }
  0x59   : > { %p2870_p1 = pnand %p2869_p2, %p2863_p4 }
  0x5b   : > { %2873 = shalt.err (!%p2870_p1)
}
  0x5c   : > { %s3649_s15 = smov 128   ;;  %s3650_s6 = smov 8  }
  0x5d   : > { %s3676_s5 = sld [smem:[#allocation28_spill]]  ;;  %s3073_s7 = smov [#allocation14]  }
  0x5e   : > { %s443_s10 = sshll.u32 %s3073_s7, 4  ;;  %s444_s10 = int_to_ptr.vmem [resolvable:$true] %s443_s10 }
  0x5f   : > { %s2885_s24 = scalar_lea.vmem %s444_s10, 4096  ;;  %p2893_p4 = scmp.lt.s32.totalorder %s444_s10, %s444_s10 }
  0x60   : > { %p2886_p13 = scmp.ne.s32.totalorder %s444_s10, %s2885_s24  ;;  %p2894_p0 = scmp.lt.s32.totalorder %s2885_s24, %s2885_s24 }
  0x62   : > { %p2888_p2 = pnand %p2886_p13, %p3234_p7  ;;  %p2895_p3 = por %p2894_p0, %p2893_p4 }
  0x63   : > { %2587 = dma.hbm_to_vmem [thread:$0]  (!%p3228_p6), %s3676_s5, 2048, %s406_s13, [#allocation10], %s3649_s15, %s3649_s15, %s3650_s6  }
  0x64   : > { %p2889_p1 = pneg %p2888_p2 }
  0x66   : > { %p2896_p5 = pnand %p2895_p3, %p2889_p1 }
  0x68   : > { %2899 = shalt.err (!%p2896_p5)
}
  0x69   : > { %s3677_s11 = sld [smem:[#allocation34_spill]]  ;;  %s2258_s8 = sadd.s32 4294967294, %s3060_s18  }
  0x6a   : > { %s41_s19 = sadd.s32 1, %s3052_s16  ;;  %s44_s4 = sadd.s32 1, %s3056_s17 }
  0x6b   : > { %p42_p7 = scmp.ge.s32.totalorder %s41_s19, 2  ;;  %s51_s14 = sadd.s32 1, %s3040_s30 }
  0x6c   : > { %p58_p9 = scmp.ne.s32.totalorder %s3040_s30, %s3036_s29  ;;  %p59_p8 = scmp.eq.s32.totalorder %s3060_s18, 0 }
  0x6d   : > { %s3712_s19 = smov (%p42_p7, %s41_s19), 0  ;;  %s3714_s4 = smov (!%p42_p7, %s44_s4), %s3056_s17 }
  0x6e   : > { %p3301_p11 = por %p59_p8, %p58_p9  ;;  %p46_p10 = scmp.ge.s32.totalorder %s3714_s4, 2 }
  0x6f   : > { %2593 = dma.hbm_to_vmem [thread:$0]  (!%p3228_p6), %s3677_s11, 4096, %s444_s10, [#allocation13], %s3649_s15, %s3649_s15, %s3650_s6  }
  0x70   : > { %p64_p6 = scmp.ne.s32.totalorder %s3036_s29, %s3032_s28  ;;  %s327_s23 = ssub.s32 %s3052_s16, %s3712_s19 }
  0x71   : > { %p3679_p12 = scmp.ne.s32.totalorder %s3667_s20, 0  ;;  %s331_s10 = sadd.s32 1, %s3028_s27 }
  0x72   : > { %s3716_s4 = smov (%p46_p10, %s3714_s4), 0  ;;  %p341_p2 = scmp.ne.s32.totalorder %s3028_s27, %s3024_s26 }
  0x73   : > { %p3311_p13 = por %p3679_p12, %p64_p6  ;;  %3681 = sst [smem:[#allocation23_spill]] %s3716_s4 }
  0x74   : > { %p347_p1 = scmp.ne.s32.totalorder %s3024_s26, %s3020_s25  ;;  %s48_s24 = ssub.s32 %s3056_s17, %s3716_s4 }
  0x75   : > { %p348_p4 = scmp.eq.s32.totalorder %s2258_s8, 3  ;;  %p49_p0 = scmp.eq.s32.totalorder %s48_s24, 0 }
  0x76   : > { %s328_s28 = sor.u32 %s327_s23, %s48_s24  ;;  %p3682_p5 = scmp.ne.s32.totalorder %s3668_s21, 0 }
  0x77   : > { %p329_p3 = scmp.eq.s32.totalorder %s328_s28, 0  ;;  %p3336_p9 = por %p348_p4, %p347_p1 }
  0x78   : > { %p3326_p7 = por %p3682_p5, %p341_p2  ;;  %p2608_p8 = scmp.lt.s32.totalorder %s3060_s18, 4 }
  0x79   : > { %s3331_s13 = scalar_select %p49_p0, %s3040_s30, %s51_s14  }
  0x7a   : > { %s3334_s15 = scalar_select %p329_p3, %s3028_s27, %s331_s10  }
  0x7b   : > { %s460_s2 = sand.u32 1, %s3040_s30   ;;  %s2313_s3 = sshll.u32 %s3056_s17, 8 }
  0x7c   : > { %s2267_s8 = sshll.u32 %s460_s2, 4  ;;  %s470_s21 = scalar_lea.hbm %s3629_s0, %s2313_s3 }
  0x7d   : > { %s464_s24 = scalar_lea.vmem [#allocation3], %s2267_s8  ;;  %p3348_p6 = pnand %p2608_p8, %p3301_p11 }
  0x7e   : > { %s471_s28 = sshll.u32 %s464_s24, 4  ;;  %s461_s10 = scalar_lea.sflag [#allocation4], %s460_s2  ;;  %s472_s28 = int_to_ptr.vmem [resolvable:$true] %s471_s28 }
  0x7f   : > { %p2902_p10 = pneg %p3348_p6  ;;  %s2913_s9 = scalar_lea.vmem %s472_s28, 256 }
  0x80   : > { %p2914_p12 = scmp.ne.s32.totalorder %s472_s28, %s2913_s9  ;;  %s3074_s11 = smov [#allocation3]  }
  0x81   : > { %s2918_s4 = sshll.u32 %s3074_s11, 4  ;;  %s2919_s4 = int_to_ptr.vmem [resolvable:$false] %s2918_s4 }
  0x82   : > { %p2916_p2 = pnand %p2914_p12, %p2902_p10  ;;  %s2920_s3 = scalar_lea.vmem %s2919_s4, 512 }
  0x83   : > { %p2921_p4 = scmp.lt.s32.totalorder %s472_s28, %s2919_s4  ;;  %p2922_p0 = scmp.lt.s32.totalorder %s2920_s3, %s2913_s9 }
  0x84   : > { %p2917_p1 = pneg %p2916_p2 }
  0x85   : > { %p2923_p3 = por %p2922_p0, %p2921_p4 }
  0x87   : > { %p2924_p11 = pnand %p2923_p3, %p2917_p1 }
  0x89   : > { %2927 = shalt.err (!%p2924_p11)
}
  0x8a   : > { %s3686_s5 = smov 8   ;;  %s3687_s12 = smov 128  }
  0x8b   : > { %2597 = dma.hbm_to_vmem [thread:$0]  (!%p3348_p6), %s470_s21, 256, %s472_s28, %s461_s10, %s3687_s12, %s3687_s12, %s3686_s5  }
  0x8c   : > { %p3688_p5 = scmp.ne.s32.totalorder %s3669_s22, 0 }
  0x8d   : > { %s485_s2 = sand.u32 (!%p3688_p5), 1, %s3036_s29  }
  0x8e   : > { %483 = sbr.rel (%p3688_p5) target bundleno = 3724 (0xe8c), region = 72  ;;  %s2271_s11 = sshll.u32 (!%p3688_p5), %s485_s2, 4 }
  0x8f   : > { %s486_s8 = scalar_lea.sflag (!%p3688_p5), [#allocation4], %s485_s2  ;;  %s3362_s23 = scalar_lea.vmem (!%p3688_p5), [#allocation3], %s2271_s11 }
  0x93   : > { %2999 = dma.done.wait (%p3311_p13), %s486_s8, 256  }
  0x94   : > { %3001 = vsyncadd (%p3311_p13), %s486_s8, 4294967040  ;;  %p3689_p8 = scmp.ne.s32.totalorder %s3667_s20, 0 }
  0x96   : > { %3003 = dma.done.wait (%p3689_p8), [#allocation7], 32  }
  0x97   : > { %3005 = vsyncadd (%p3689_p8), [#allocation7], 4294967264 }
  0x98   : > { %3007 = dma.done.wait (%p3689_p8), [#allocation10], 8192  }
  0x99   : > { %3009 = vsyncadd (%p3689_p8), [#allocation10], 4294959104 }
  0x9a   : > { %3011 = dma.done.wait (%p3689_p8), [#allocation13], 8192  }
  0x9b   : > { %3013 = vsyncadd (%p3689_p8), [#allocation13], 4294959104  ;;  %s3690_s9 = sld [smem:[#allocation21_spill]]  ;;  %s553_s22 = sand.u32 1, %s3024_s26  }
  0x9c   : > { %s3384_s7 = sshll.u32 %s553_s22, 3 }
  0x9d   : > { %s555_s21 = scalar_lea.vmem [#allocation15], %s3384_s7 }
  0xa1   : > { %s2279_s4 = sshll.u32 %s3690_s9, 3  ;;  %p2280_p13 = scmp.ne.s32.totalorder %s3690_s9, 0 }
  0xa2   : > { %s3691_s28 = sld [smem:[#allocation27_spill]] (!%p2280_p13) }
  0xa3   : > { %560 = sbr.rel (%p2280_p13) target bundleno = 677 (0x2a5), region = 104 }
  0xa8   : > { %v561_v0 = vld [vmem:[%s3362_s23] sm:$0xff]  ;;  %v562_v1 = vld [vmem:[%s3362_s23 + $0x8] sm:$0xff]  ;;  %v3075_v56 = vmov 0.0  }
  0xa9   : > { %565 = vadd.xlane.f32.xlu0 %v561_v0  ;;  %v650_v2 = vld [vmem:[#allocation9 + $0x170] sm:$0xff]  ;;  %v649_v3 = vld [vmem:[#allocation9 + $0x168] sm:$0xff]  ;;  %v647_v4 = vld [vmem:[#allocation9 + $0x158] sm:$0xff]  ;;  %733 = vmatprep.mubr.f32.mxu0 %v3075_v56 }
  0xaa   : > { %669 = vmatprep.subr.mxu0 %v650_v2  ;;  %v646_v5 = vld [vmem:[#allocation9 + $0x150] sm:$0xff]  ;;  %v651_v6 = vld [vmem:[#allocation9 + $0x178] sm:$0xff]  ;;  %v644_v7 = vld [vmem:[#allocation9 + $0x140] sm:$0xff] }
  0xab   : > { %670 = vmatpush1.msra.mxu0 %v649_v3  ;;  %2412 = vmatprep.subr.mxu1 %v651_v6  ;;  %v648_v8 = vld [vmem:[#allocation9 + $0x160] sm:$0xff]  ;;  %v643_v9 = vld [vmem:[#allocation9 + $0x138] sm:$0xff]  ;;  %v641_v10 = vld [vmem:[#allocation9 + $0x128] sm:$0xff] }
  0xac   : > { %671 = vmatprep.subr.mxu0 %v647_v4  ;;  %2413 = vmatpush3.msra.mxu1 %v651_v6  ;;  %v640_v11 = vld [vmem:[#allocation9 + $0x120] sm:$0xff]  ;;  %v638_v20 = vld [vmem:[#allocation9 + $0x110] sm:$0xff]  ;;  %v645_v21 = vld [vmem:[#allocation9 + $0x148] sm:$0xff] }
  0xad   : > { %567 = vadd.xlane.f32.xlu0 %v562_v1  ;;  %672 = vmatpush1.msra.mxu0 %v646_v5  ;;  %v637_v22 = vld [vmem:[#allocation9 + $0x108] sm:$0xff]  ;;  %v635_v23 = vld [vmem:[#allocation9 + $0xf8] sm:$0xff]  ;;  %v642_v24 = vld [vmem:[#allocation9 + $0x130] sm:$0xff] }
  0xae   : > { %2414 = vmatprep.subr.mxu1 %v648_v8  ;;  %673 = vmatprep.subr.mxu0 %v644_v7  ;;  %v634_v25 = vld [vmem:[#allocation9 + $0xf0] sm:$0xff]  ;;  %v632_v26 = vld [vmem:[#allocation9 + $0xe0] sm:$0xff]  ;;  %v639_v27 = vld [vmem:[#allocation9 + $0x118] sm:$0xff] }
  0xaf   : > { %2415 = vmatpush3.msra.mxu1 %v648_v8  ;;  %674 = vmatpush1.msra.mxu0 %v643_v9  ;;  %v631_v28 = vld [vmem:[#allocation9 + $0xd8] sm:$0xff]  ;;  %v629_v29 = vld [vmem:[#allocation9 + $0xc8] sm:$0xff]  ;;  %v636_v30 = vld [vmem:[#allocation9 + $0x100] sm:$0xff] }
  0xb0   : > { %675 = vmatprep.subr.mxu0 %v641_v10  ;;  %2416 = vmatprep.subr.mxu1 %v645_v21  ;;  %v628_v31 = vld [vmem:[#allocation9 + $0xc0] sm:$0xff]  ;;  %v626_v32 = vld [vmem:[#allocation9 + $0xb0] sm:$0xff]  ;;  %v633_v33 = vld [vmem:[#allocation9 + $0xe8] sm:$0xff] }
  0xb1   : > { %676 = vmatpush1.msra.mxu0 %v640_v11  ;;  %2417 = vmatpush3.msra.mxu1 %v645_v21  ;;  %v625_v34 = vld [vmem:[#allocation9 + $0xa8] sm:$0xff]  ;;  %v623_v35 = vld [vmem:[#allocation9 + $0x98] sm:$0xff]  ;;  %v630_v36 = vld [vmem:[#allocation9 + $0xd0] sm:$0xff]  ;;  %v654_v11 = vlaneseq }
  0xb2   : > { %677 = vmatprep.subr.mxu0 %v638_v20  ;;  %2418 = vmatprep.subr.mxu1 %v642_v24  ;;  %v622_v37 = vld [vmem:[#allocation9 + $0x90] sm:$0xff]  ;;  %v620_v38 = vld [vmem:[#allocation9 + $0x80] sm:$0xff]  ;;  %v627_v39 = vld [vmem:[#allocation9 + $0xb8] sm:$0xff] }
  0xb3   : > { %678 = vmatpush1.msra.mxu0 %v637_v22  ;;  %2419 = vmatpush3.msra.mxu1 %v642_v24  ;;  %v619_v40 = vld [vmem:[#allocation9 + $0x78] sm:$0xff]  ;;  %v617_v41 = vld [vmem:[#allocation9 + $0x68] sm:$0xff]  ;;  %v624_v42 = vld [vmem:[#allocation9 + $0xa0] sm:$0xff] }
  0xb4   : > { %679 = vmatprep.subr.mxu0 %v635_v23  ;;  %2420 = vmatprep.subr.mxu1 %v639_v27  ;;  %v616_v43 = vld [vmem:[#allocation9 + $0x60] sm:$0xff]  ;;  %v614_v44 = vld [vmem:[#allocation9 + $0x50] sm:$0xff]  ;;  %v621_v45 = vld [vmem:[#allocation9 + $0x88] sm:$0xff] }
  0xb5   : > { %680 = vmatpush1.msra.mxu0 %v634_v25  ;;  %2421 = vmatpush3.msra.mxu1 %v639_v27  ;;  %v613_v46 = vld [vmem:[#allocation9 + $0x48] sm:$0xff]  ;;  %v611_v47 = vld [vmem:[#allocation9 + $0x38] sm:$0xff]  ;;  %v618_v48 = vld [vmem:[#allocation9 + $0x70] sm:$0xff] }
  0xb6   : > { %681 = vmatprep.subr.mxu0 %v632_v26  ;;  %2422 = vmatprep.subr.mxu1 %v636_v30  ;;  %v610_v49 = vld [vmem:[#allocation9 + $0x30] sm:$0xff]  ;;  %v608_v50 = vld [vmem:[#allocation9 + $0x20] sm:$0xff]  ;;  %v615_v51 = vld [vmem:[#allocation9 + $0x58] sm:$0xff] }
  0xb7   : > { %682 = vmatpush1.msra.mxu0 %v631_v28  ;;  %2423 = vmatpush3.msra.mxu1 %v636_v30  ;;  %v607_v52 = vld [vmem:[#allocation9 + $0x18] sm:$0xff]  ;;  %v605_v53 = vld [vmem:[#allocation9 + $0x8] sm:$0xff]  ;;  %v612_v54 = vld [vmem:[#allocation9 + $0x40] sm:$0xff] }
  0xb8   : > { %683 = vmatprep.subr.mxu0 %v629_v29  ;;  %2424 = vmatprep.subr.mxu1 %v633_v33  ;;  %v604_v55 = vld [vmem:[#allocation9] sm:$0xff]  ;;  %v609_v57 = vld [vmem:[#allocation9 + $0x28] sm:$0xff]  ;;  %v606_v58 = vld [vmem:[#allocation9 + $0x10] sm:$0xff] }
  0xb9   : > { %684 = vmatpush1.msra.mxu0 %v628_v31  ;;  %2425 = vmatpush3.msra.mxu1 %v633_v33  ;;  %v2281_v2 = vld [vmem:[#allocation6] ss:$0 sm:$0xff]  ;;  %v2282_v4 = vld [vmem:[#allocation8] ss:$0 sm:$0xff] }
  0xba   : > { %685 = vmatprep.subr.mxu0 %v626_v32  ;;  %2426 = vmatprep.subr.mxu1 %v630_v36 }
  0xbb   : > { %686 = vmatpush1.msra.mxu0 %v625_v34  ;;  %2427 = vmatpush3.msra.mxu1 %v630_v36 }
  0xbc   : > { %687 = vmatprep.subr.mxu0 %v623_v35  ;;  %2428 = vmatprep.subr.mxu1 %v627_v39 }
  0xbd   : > { %688 = vmatpush1.msra.mxu0 %v622_v37  ;;  %2429 = vmatpush3.msra.mxu1 %v627_v39 }
  0xbe   : > { %689 = vmatprep.subr.mxu0 %v620_v38  ;;  %2430 = vmatprep.subr.mxu1 %v624_v42 }
  0xbf   : > { %690 = vmatpush1.msra.mxu0 %v619_v40  ;;  %2431 = vmatpush3.msra.mxu1 %v624_v42 }
  0xc0   : > { %691 = vmatprep.subr.mxu0 %v617_v41  ;;  %2432 = vmatprep.subr.mxu1 %v621_v45 }
  0xc1   : > { %692 = vmatpush1.msra.mxu0 %v616_v43  ;;  %2433 = vmatpush3.msra.mxu1 %v621_v45 }
  0xc2   : > { %693 = vmatprep.subr.mxu0 %v614_v44  ;;  %2434 = vmatprep.subr.mxu1 %v618_v48 }
  0xc3   : > { %694 = vmatpush1.msra.mxu0 %v613_v46  ;;  %2435 = vmatpush3.msra.mxu1 %v618_v48 }
  0xc4   : > { %695 = vmatprep.subr.mxu0 %v611_v47  ;;  %2436 = vmatprep.subr.mxu1 %v615_v51 }
  0xc5   : > { %696 = vmatpush1.msra.mxu0 %v610_v49  ;;  %2437 = vmatpush3.msra.mxu1 %v615_v51 }
  0xc6   : > { %697 = vmatprep.subr.mxu0 %v608_v50  ;;  %2438 = vmatprep.subr.mxu1 %v612_v54 }
  0xc7   : > { %698 = vmatpush1.msra.mxu0 %v607_v52  ;;  %2439 = vmatpush3.msra.mxu1 %v612_v54 }
  0xc8   : > { %699 = vmatprep.subr.mxu0 %v605_v53  ;;  %2440 = vmatprep.subr.mxu1 %v609_v57 }
  0xc9   : > { %700 = vmatpush1.msra.mxu0 %v604_v55  ;;  %2441 = vmatpush3.msra.mxu1 %v609_v57 }
  0xca   : > { %2442 = vmatprep.subr.mxu1 %v606_v58 }
  0xcb   : > { %2443 = vmatpush3.msra.mxu1 %v606_v58 }
 0x132   : > { %v566_v12 = vpop.xlane.xlu0 %565 }
 0x133   : > { %v570_v13 = vmul.f32 0.0078125, %v566_v12  ;;  %v655_v12 = vshrl.u32 %v654_v11, 7 }
 0x135   : > { %v3390_v14 = vsub.f32 %v561_v0, %v570_v13  ;;  %v656_v13 = vsub.s32 0, %v655_v12 }
 0x136   : > { %v568_v15 = vpop.xlane.xlu0 %567 }
 0x137   : > { %v571_v16 = vmul.f32 0.0078125, %v568_v15  ;;  %v574_v17 = vmul.f32 %v3390_v14, %v3390_v14  ;;  %v660_v15 = vsub.s32 1, %v655_v12 }
 0x139   : > { %v3394_v18 = vsub.f32 %v562_v1, %v571_v16  ;;  %576 = vadd.xlane.f32.xlu1 %v574_v17  ;;  %v664_v17 = vsub.s32 2, %v655_v12 }
 0x13b   : > { %v575_v19 = vmul.f32 %v3394_v18, %v3394_v18 }
 0x13d   : > { %578 = vadd.xlane.f32.xlu1 %v575_v19 }
 0x1c2   : > { %v577_v59 = vpop.xlane.xlu1 %576 }
 0x1c3   : > { %v580_v60 = vmul.f32 0.0078125, %v577_v59 }
 0x1c5   : > { %v582_v61 = vadd.f32 1e-16, %v580_v60 }
 0x1c6   : > { %v579_v62 = vpop.xlane.xlu1 %578 }
 0x1c7   : > { %2722 = vrsqrt.f32 %v582_v61  ;;  %v581_v63 = vmul.f32 0.0078125, %v579_v62 }
 0x1c9   : > { %v583_v0 = vadd.f32 1e-16, %v581_v63 }
 0x1cb   : > { %2724 = vrsqrt.f32 %v583_v0 }
 0x1d4   : > { %v2723_v1 = vpop.eup %2722 }
 0x1d5   : > { %v586_v3 = vmul.f32 %v2723_v1, %v3390_v14  ;;  %v652_v14 = vld [vmem:[%s3691_s28] sm:$0x7] }
 0x1d6   : > { %v657_v16 = vrot.slane %v652_v14, %v656_v13  ;;  %v661_v19 = vrot.slane %v652_v14, %v660_v15  ;;  %v665_v21 = vrot.slane %v652_v14, %v664_v17 }
 0x1d7   : > { %v594_v5 = vmul.f32 %v2281_v2, %v586_v3 }
 0x1d8   : > { %v2725_v6 = vpop.eup %2724 }
 0x1d9   : > { %v602_v7 = vadd.f32 %v2282_v4, %v594_v5  ;;  %v587_v8 = vmul.f32 %v2725_v6, %v3394_v18 }
 0x1db   : > { %734 = vmatmul.mubr.f32.vlgmr.msra.gmra.mxu0 %v602_v7  ;;  %2444 = vmatprep.mubr.f32.mxu1 %v602_v7  ;;  %v595_v9 = vmul.f32 %v2281_v2, %v587_v8 }
 0x1dc   : > { %739 = vmatprep.mubr.f32.mxu0 %v3075_v56 }
 0x1dd   : > { %v603_v10 = vadd.f32 %v2282_v4, %v595_v9 }
 0x1df   : > { %740 = vmatmul.mubr.f32.gmra.mxu0 %v603_v10  ;;  %2445 = vmatmul.mubr.f32.vlgmr.msra.gmra.mxu1 %v603_v10 }
 0x29b   : > { %v735_v20 = vpop.f32.mrf.mxu0 }
 0x29c   : > { %v736_v18 = vadd.f32 %v735_v20, %v657_v16 }
 0x29d   : > { %v737_v22 = vpop.f32.mrf.mxu0 }
 0x29e   : > { %821 = vst [vmem:[#allocation2] sm:$0xff] %v736_v18  ;;  %v738_v23 = vadd.f32 %v737_v22, %v661_v19 }
 0x29f   : > { %v741_v24 = vpop.f32.mrf.mxu0  ;;  %v2446_v25 = vpop.f32.mrf.mxu1 }
 0x2a0   : > { %822 = vst [vmem:[#allocation2 + $0x8] sm:$0xff] %v738_v23  ;;  %v742_v26 = vadd.f32 %v741_v24, %v657_v16  ;;  %v818_v27 = vadd.f32 %v2446_v25, %v665_v21 }
 0x2a1   : > { %v743_v28 = vpop.f32.mrf.mxu0  ;;  %v812_v29 = vpop.f32.mrf.mxu1 }
 0x2a2   : > { %824 = vst [vmem:[#allocation2 + $0x18] sm:$0xff] %v742_v26  ;;  %826 = vst [vmem:[#allocation2 + $0x28] sm:$0xff] %v818_v27  ;;  %v744_v30 = vadd.f32 %v743_v28, %v661_v19  ;;  %v813_v31 = vadd.f32 %v812_v29, %v665_v21 }
 0x2a4   : > { %825 = vst [vmem:[#allocation2 + $0x20] sm:$0xff] %v744_v30  ;;  %823 = vst [vmem:[#allocation2 + $0x10] sm:$0xff] %v813_v31 }
 0x2a5 PF: > { %s3692_s14 = sld [smem:[#allocation21_spill]]  ;;  %vm837_vm0 = vcmask 261120   ;;  %s827_s10 = sshra.s32 %s2279_s4, 3  ;;  %v3076_v33 = vmov 0.0   ;;  %vm3077_vm1 = vmmov 0   ;;  %vm917_vm2 = vcmask 130048  }
 0x2a6   : > { %2447 = vmatprep.subr.mxu0 %v3076_v33  ;;  %2451 = vmatprep.mubr.msk.f32.mxu0 %vm3077_vm1, %v3076_v33  ;;  %s2314_s3 = smul.u32 24, %s827_s10  ;;  %s3078_s12 = smov 96   ;;  %v1183_v63 = vld [vmem:[#allocation11 + $0x38] sm:$0xff]  ;;  %v1182_v0 = vld [vmem:[#allocation11 + $0x30] sm:$0xff]  ;;  %v1181_v1 = vld [vmem:[#allocation11 + $0x28] sm:$0xff] }
 0x2a7   : > { %2454 = vmatprep.subr.mxu1 %v3076_v33  ;;  %v3414_v34 = vld [vmem:[#allocation2 + $0x8] sm:$0xff]  ;;  %2458 = vmatprep.mubr.msk.f32.mxu1 %vm3077_vm1, %v3076_v33  ;;  %s3079_s2 = smov 64   ;;  %v1180_v2 = vld [vmem:[#allocation11 + $0x20] sm:$0xff]  ;;  %s3080_s11 = smov 32   ;;  %v1003_v9 = vld [vmem:[#allocation11 + $0x8] sm:$0xff] }
 0x2a8   : > { %s831_s5 = scalar_lea.vmem [#allocation2], %s2314_s3  ;;  %v1005_v7 = vld [vmem:[#allocation11 + $0x18] sm:$0xff]  ;;  %v1004_v8 = vld [vmem:[#allocation11 + $0x10] sm:$0xff]  ;;  %v1002_v10 = vld [vmem:[#allocation11] sm:$0xff]  ;;  %s1830_s8 = scalar_lea.vmem %s3362_s23, %s2279_s4 [#allocation3] }
 0x2a9   : > { %v3433_v44 = vld [vmem:[#allocation2 + $0x28] sm:$0xff]  ;;  %s3693_s24 = sld [smem:[#allocation29_spill]]  ;;  %s2113_s10 = sshll.u32 %s555_s21, 4  ;;  %s2114_s10 = int_to_ptr.vmem [resolvable:$true] %s2113_s10 }
 0x2aa   : > { %2455 = vmatpush3.msra.mxu1 %v3433_v44  ;;  %s3694_s28 = sld [smem:[#allocation30_spill]] }
 0x2ab   : > { %v3403_v32 = vld [vmem:[#allocation2 + $0x20] sm:$0xff]  ;;  %v3435_v45 = vld [vmem:[#allocation2 + $0x10] sm:$0xff]  ;;  %2456 = vmatprep.subr.mxu1 %v3076_v33  ;;  %s3698_s4 = sld [smem:[#allocation35_spill]] }
 0x2ac   : > { %2448 = vmatpush3.xpose.msk.msra.mxu0 %vm837_vm0, %v3403_v32  ;;  %v3420_v35 = vld [vmem:[%s831_s5] sm:$0xff]  ;;  %1010 = vrot.lane.b32.xlu1 %v3403_v32, %s3078_s12  ;;  %s3695_s5 = sld [smem:[#allocation31_spill]] }
 0x2ad   : > { %2449 = vmatprep.subr.mxu0 %v3076_v33  ;;  %2457 = vmatpush3.msra.mxu1 %v3435_v45 }
 0x2ae   : > { %2461 = vmatprep.subr.mxu1 %v3076_v33 }
 0x2b0   : > { %2450 = vmatpush3.xpose.msk.msra.mxu0 %vm837_vm0, %v3414_v34  ;;  %1008 = vrot.lane.b32.xlu1 %v3414_v34, %s3078_s12 }
 0x2b1   : > { %2475 = vmatprep.subr.mxu0 %v3076_v33 }
 0x2b3   : > { %2452 = vmatmul.mubr.msk.f32.vlgmr.msra.gmra.mxu0 %vm837_vm0, %v3420_v35 }
 0x2b4   : > { %2483 = vmatprep.mubr.msk.f32.mxu0 %vm3077_vm1, %v3076_v33  ;;  %2476 = vmatpush3.msra.mxu0 %v1183_v63 }
 0x2b5   : > { %2477 = vmatprep.subr.mxu0 %v3076_v33 }
 0x2b6   : > { %2478 = vmatpush3.msra.mxu0 %v1182_v0 }
 0x2b7   : > { %2479 = vmatprep.subr.mxu0 %v3076_v33 }
 0x2b8   : > { %2480 = vmatpush3.msra.mxu0 %v1181_v1 }
 0x2b9   : > { %2481 = vmatprep.subr.mxu0 %v3076_v33 }
 0x2ba   : > { %2482 = vmatpush3.msra.mxu0 %v1180_v2 }
 0x2bb   : > { %2497 = vmatprep.subr.mxu0 %v3076_v33 }
 0x31e   : > { %v1011_v47 = vpop.permute.xlu1 %1010 }
 0x322   : > { %v1009_v50 = vpop.permute.xlu1 %1008 }
 0x373   : > { %v913_v36 = vpop.f32.mrf.mxu0 }
 0x374   : > { %v918_v37 = vsel %vm917_vm2, %v913_v36, -inf }
 0x375   : > { %919 = vmax.xlane.f32.xlu0 %v918_v37  ;;  %v2453_v38 = vpop.f32.mrf.mxu0 }
 0x3fe   : > { %v920_v39 = vpop.xlane.xlu0 %919 }
 0x3ff   : > { %v921_v40 = vsub.f32 %v913_v36, %v920_v39 }
 0x401   : > { %v922_v41 = vmul.f32 1.442695, %v921_v40 }
 0x403   : > { %2726 = vpow2.f32 %v922_v41 }
 0x410   : > { %v2727_v42 = vpop.eup %2726 }
 0x411   : > { %v924_v43 = vsel %vm917_vm2, %v2727_v42, 0.0 }
 0x412   : > { %925 = vadd.xlane.f32.xlu0 %v924_v43 }
 0x428   : > { %1006 = vrot.lane.b32.xlu0 %v3420_v35, %s3078_s12 }
 0x49b   : > { %v926_v46 = vpop.xlane.xlu0 %925 }
 0x49c   : > { %2728 = vrcp.f32 %v926_v46  ;;  %v1505_v46 = vld [vmem:[#allocation11 + $0x58] sm:$0xff] }
 0x49f   : > { %v1007_v51 = vpop.permute.xlu0 %1006 }
 0x4a9   : > { %v2729_v48 = vpop.eup %2728 }
 0x4aa   : > { %v928_v49 = vmul.f32 %v2729_v48, %v2727_v42  ;;  %v1503_v48 = vld [vmem:[#allocation11 + $0x48] sm:$0xff] }
 0x4ac   : > { %2459 = vmatmul.mubr.msk.f32.vlgmr.msra.gmra.mxu1 %vm917_vm2, %v928_v49  ;;  %v1755_v49 = vld [vmem:[#allocation11 + $0x78] sm:$0xff] }
 0x4ad   : > { %2462 = vmatpush3.xpose.msk.msra.mxu1 %vm837_vm0, %v1011_v47  ;;  %2465 = vmatprep.mubr.msk.f32.mxu1 %vm3077_vm1, %v3076_v33  ;;  %v1504_v47 = vld [vmem:[#allocation11 + $0x50] sm:$0xff] }
 0x4ae   : > { %2463 = vmatprep.subr.mxu1 %v3076_v33 }
 0x4b1   : > { %2464 = vmatpush3.xpose.msk.msra.mxu1 %vm837_vm0, %v1009_v50 }
 0x4b2   : > { %2468 = vmatprep.subr.mxu1 %v3076_v33 }
 0x4b4   : > { %2466 = vmatmul.mubr.msk.f32.vlgmr.msra.gmra.mxu1 %vm837_vm0, %v1007_v51 }
 0x4b5   : > { %2472 = vmatprep.mubr.msk.f32.mxu1 %vm3077_vm1, %v3076_v33 }
 0x56c   : > { %v998_v52 = vpop.f32.mrf.mxu1 }
 0x56e   : > { %v2460_v53 = vpop.f32.mrf.mxu1 }
 0x574   : > { %v1084_v54 = vpop.f32.mrf.mxu1 }
 0x575   : > { %v1088_v55 = vsel %vm917_vm2, %v1084_v54, -inf }
 0x576   : > { %1089 = vmax.xlane.f32.xlu1 %v1088_v55  ;;  %v2467_v56 = vpop.f32.mrf.mxu1 }
 0x587   : > { %1103 = vrot.lane.b32.xlu1 %v3433_v44, %s3078_s12 }
 0x58b   : > { %1334 = vrot.lane.b32.xlu1 %v3403_v32, %s3079_s2 }
 0x58f   : > { %1332 = vrot.lane.b32.xlu1 %v3414_v34, %s3079_s2 }
 0x593   : > { %1330 = vrot.lane.b32.xlu1 %v3420_v35, %s3079_s2 }
 0x597   : > { %1584 = vrot.lane.b32.xlu1 %v3403_v32, %s3080_s11 }
 0x59b   : > { %1582 = vrot.lane.b32.xlu1 %v3414_v34, %s3080_s11 }
 0x59f   : > { %1580 = vrot.lane.b32.xlu1 %v3420_v35, %s3080_s11 }
 0x5ff   : > { %v1090_v57 = vpop.xlane.xlu1 %1089 }
 0x600   : > { %v1091_v58 = vsub.f32 %v1084_v54, %v1090_v57  ;;  %v1754_v57 = vld [vmem:[#allocation11 + $0x70] sm:$0xff] }
 0x602   : > { %v1092_v59 = vmul.f32 1.442695, %v1091_v58  ;;  %v1753_v58 = vld [vmem:[#allocation11 + $0x68] sm:$0xff] }
 0x603   : > { %v1104_v62 = vpop.permute.xlu1 %1103 }
 0x604   : > { %2730 = vpow2.f32 %v1092_v59  ;;  %2469 = vmatpush3.msra.mxu1 %v1104_v62  ;;  %v1752_v59 = vld [vmem:[#allocation11 + $0x60] sm:$0xff] }
 0x605   : > { %2470 = vmatprep.subr.mxu1 %v3076_v33 }
 0x607   : > { %v1335_v11 = vpop.permute.xlu1 %1334 }
 0x60b   : > { %v1333_v12 = vpop.permute.xlu1 %1332 }
 0x60f   : > { %v1331_v13 = vpop.permute.xlu1 %1330 }
 0x611   : > { %v2731_v60 = vpop.eup %2730 }
 0x612   : > { %v1094_v61 = vsel %vm917_vm2, %v2731_v60, 0.0 }
 0x613   : > { %1095 = vadd.xlane.f32.xlu0 %v1094_v61  ;;  %v1585_v16 = vpop.permute.xlu1 %1584 }
 0x617   : > { %v1583_v19 = vpop.permute.xlu1 %1582 }
 0x61b   : > { %v1581_v18 = vpop.permute.xlu1 %1580 }
 0x629   : > { %1101 = vrot.lane.b32.xlu0 %v3435_v45, %s3078_s12  ;;  %s3696_s12 = sld [smem:[#allocation22_spill]] }
 0x62f   : > { %s2309_s9 = sshll.u32 %s3696_s12, 1  ;;  %s2928_s12 = scalar_lea.vmem %s2114_s10, 128 }
 0x630   : > { %s2109_s20 = sadd.s32 %s3692_s14, %s2309_s9  ;;  %s2098_s14 = scalar_lea.sflag [#allocation5], %s553_s22 }
 0x631   : > { %p2929_p6 = scmp.ne.s32.totalorder %s2114_s10, %s2928_s12 }
 0x633   : > { %p2930_p10 = pnand %p2929_p6, %p3326_p7 }
 0x635   : > { %p2931_p12 = pneg %p2930_p10 }
 0x69c   : > { %v1096_v3 = vpop.xlane.xlu0 %1095 }
 0x69d   : > { %2732 = vrcp.f32 %v1096_v3  ;;  %v1831_v3 = vld [vmem:[%s1830_s8] sm:$0xff]  ;;  %s3697_s8 = sld [smem:[#allocation33_spill]] }
 0x6a0   : > { %v1102_v4 = vpop.permute.xlu0 %1101 }
 0x6a1   : > { %2471 = vmatpush3.msra.mxu1 %v1102_v4 }
 0x6a2   : > { %2486 = vmatprep.subr.mxu1 %v3076_v33 }
 0x6aa   : > { %v2733_v5 = vpop.eup %2732 }
 0x6ab   : > { %v1098_v6 = vmul.f32 %v2733_v5, %v2731_v60 }
 0x6ad   : > { %2473 = vmatmul.mubr.msk.f32.vlgmr.msra.gmra.mxu1 %vm917_vm2, %v1098_v6 }
 0x6ae   : > { %2487 = vmatpush3.msra.mxu1 %v1005_v7  ;;  %2494 = vmatprep.mubr.msk.f32.mxu1 %vm3077_vm1, %v3076_v33 }
 0x6af   : > { %2488 = vmatprep.subr.mxu1 %v3076_v33 }
 0x6b0   : > { %2489 = vmatpush3.msra.mxu1 %v1004_v8  ;;  %v1900_v8 = vld [vmem:[#allocation12 + $0xf8] sm:$0xff] }
 0x6b1   : > { %2490 = vmatprep.subr.mxu1 %v3076_v33 }
 0x6b2   : > { %2491 = vmatpush3.msra.mxu1 %v1003_v9  ;;  %v1899_v9 = vld [vmem:[#allocation12 + $0xf0] sm:$0xff] }
 0x6b3   : > { %2492 = vmatprep.subr.mxu1 %v3076_v33 }
 0x6b4   : > { %2493 = vmatpush3.msra.mxu1 %v1002_v10  ;;  %v1898_v10 = vld [vmem:[#allocation12 + $0xe8] sm:$0xff] }
 0x6b5   : > { %2495 = vmatmul.mubr.msk.f32.vlgmr.msra.gmra.mxu1 %vm837_vm0, %v998_v52  ;;  %2504 = vmatprep.subr.mxu1 %v3076_v33 }
 0x6b6   : > { %2508 = vmatprep.mubr.msk.f32.mxu1 %vm3077_vm1, %v3076_v33 }
 0x76d   : > { %v1176_v14 = vpop.f32.mrf.mxu1 }
 0x76e   : > { %2484 = vmatmul.mubr.msk.f32.vlgmr.msra.gmra.mxu0 %vm837_vm0, %v1176_v14  ;;  %v1894_v14 = vld [vmem:[#allocation12 + $0xc8] sm:$0xff] }
 0x76f   : > { %2498 = vmatpush3.xpose.msk.msra.mxu0 %vm837_vm0, %v1335_v11  ;;  %v2474_v15 = vpop.f32.mrf.mxu1  ;;  %2501 = vmatprep.mubr.msk.f32.mxu0 %vm3077_vm1, %v3076_v33  ;;  %v1897_v11 = vld [vmem:[#allocation12 + $0xe0] sm:$0xff] }
 0x770   : > { %2499 = vmatprep.subr.mxu0 %v3076_v33  ;;  %v1893_v15 = vld [vmem:[#allocation12 + $0xc0] sm:$0xff] }
 0x773   : > { %2500 = vmatpush3.xpose.msk.msra.mxu0 %vm837_vm0, %v1333_v12  ;;  %v1896_v12 = vld [vmem:[#allocation12 + $0xd8] sm:$0xff] }
 0x774   : > { %2522 = vmatprep.subr.mxu0 %v3076_v33 }
 0x775   : > { %v3494_v17 = vpop.f32.mrf.mxu1 }
 0x776   : > { %2502 = vmatmul.mubr.msk.f32.vlgmr.msra.gmra.mxu0 %vm837_vm0, %v1331_v13  ;;  %v1895_v13 = vld [vmem:[#allocation12 + $0xd0] sm:$0xff] }
 0x777   : > { %v2496_v20 = vpop.f32.mrf.mxu1  ;;  %2523 = vmatpush3.xpose.msk.msra.mxu0 %vm837_vm0, %v1585_v16  ;;  %2526 = vmatprep.mubr.msk.f32.mxu0 %vm3077_vm1, %v3076_v33 }
 0x778   : > { %2524 = vmatprep.subr.mxu0 %v3076_v33 }
 0x77b   : > { %2525 = vmatpush3.xpose.msk.msra.mxu0 %vm837_vm0, %v1583_v19 }
 0x77c   : > { %2536 = vmatprep.subr.mxu0 %v3076_v33 }
 0x77e   : > { %2527 = vmatmul.mubr.msk.f32.vlgmr.msra.gmra.mxu0 %vm837_vm0, %v1581_v18  ;;  %v1892_v18 = vld [vmem:[#allocation12 + $0xb8] sm:$0xff] }
 0x77f   : > { %2544 = vmatprep.mubr.msk.f32.mxu0 %vm3077_vm1, %v3076_v33  ;;  %2537 = vmatpush3.msra.mxu0 %v1755_v49  ;;  %v2015_v49 = vld [vmem:[#allocation14 + $0xe8] sm:$0xff] }
 0x780   : > { %2538 = vmatprep.subr.mxu0 %v3076_v33 }
 0x781   : > { %2539 = vmatpush3.msra.mxu0 %v1754_v57  ;;  %v2011_v57 = vld [vmem:[#allocation14 + $0xc8] sm:$0xff] }
 0x782   : > { %2540 = vmatprep.subr.mxu0 %v3076_v33 }
 0x783   : > { %2541 = vmatpush3.msra.mxu0 %v1753_v58  ;;  %v1995_v58 = vld [vmem:[#allocation14 + $0x48] sm:$0xff] }
 0x784   : > { %2542 = vmatprep.subr.mxu0 %v3076_v33 }
 0x785   : > { %2543 = vmatpush3.msra.mxu0 %v1752_v59  ;;  %v2010_v59 = vld [vmem:[#allocation14 + $0xc0] sm:$0xff] }
 0x82e   : > { %v3506_v21 = vpop.f32.mrf.mxu0 }
 0x82f   : > { %v1327_v60 = vadd.f32 %v3494_v17, %v3506_v21  ;;  %v1891_v21 = vld [vmem:[#allocation12 + $0xb0] sm:$0xff] }
 0x830   : > { %v2485_v22 = vpop.f32.mrf.mxu0 }
 0x831   : > { %v1890_v22 = vld [vmem:[#allocation12 + $0xa8] sm:$0xff] }
 0x836   : > { %v1408_v23 = vpop.f32.mrf.mxu0 }
 0x837   : > { %v1412_v24 = vsel %vm917_vm2, %v1408_v23, -inf }
 0x838   : > { %1413 = vmax.xlane.f32.xlu0 %v1412_v24  ;;  %v2503_v25 = vpop.f32.mrf.mxu0  ;;  %v1888_v24 = vld [vmem:[#allocation12 + $0x98] sm:$0xff] }
 0x839   : > { %v1887_v25 = vld [vmem:[#allocation12 + $0x90] sm:$0xff] }
 0x83e   : > { %v1658_v26 = vpop.f32.mrf.mxu0 }
 0x83f   : > { %v1662_v28 = vsel %vm917_vm2, %v1658_v26, -inf }
 0x840   : > { %v2528_v27 = vpop.f32.mrf.mxu0 }
 0x841   : > { %v1885_v27 = vld [vmem:[#allocation12 + $0x80] sm:$0xff] }
 0x84e   : > { %1425 = vrot.lane.b32.xlu0 %v3433_v44, %s3079_s2 }
 0x86d   : > { %1663 = vmax.xlane.f32.xlu0 %v1662_v28  ;;  %v1884_v28 = vld [vmem:[#allocation12 + $0x78] sm:$0xff] }
 0x883   : > { %1675 = vrot.lane.b32.xlu0 %v3433_v44, %s3080_s11 }
 0x8c1   : > { %v1414_v29 = vpop.xlane.xlu0 %1413 }
 0x8c2   : > { %v1415_v30 = vsub.f32 %v1408_v23, %v1414_v29  ;;  %v1889_v23 = vld [vmem:[#allocation12 + $0xa0] sm:$0xff]  ;;  %v1883_v29 = vld [vmem:[#allocation12 + $0x70] sm:$0xff] }
 0x8c4   : > { %v1416_v31 = vmul.f32 1.442695, %v1415_v30  ;;  %v1882_v30 = vld [vmem:[#allocation12 + $0x68] sm:$0xff] }
 0x8c5   : > { %v1426_v32 = vpop.permute.xlu0 %1425 }
 0x8c6   : > { %2734 = vpow2.f32 %v1416_v31  ;;  %2505 = vmatpush3.msra.mxu1 %v1426_v32  ;;  %v1881_v31 = vld [vmem:[#allocation12 + $0x60] sm:$0xff]  ;;  %v1880_v32 = vld [vmem:[#allocation12 + $0x58] sm:$0xff] }
 0x8c7   : > { %2506 = vmatprep.subr.mxu1 %v3076_v33 }
 0x8d3   : > { %v2735_v34 = vpop.eup %2734 }
 0x8d4   : > { %v1418_v35 = vsel %vm917_vm2, %v2735_v34, 0.0 }
 0x8d5   : > { %1419 = vadd.xlane.f32.xlu1 %v1418_v35  ;;  %v1878_v35 = vld [vmem:[#allocation12 + $0x48] sm:$0xff] }
 0x8e6   : > { %1423 = vrot.lane.b32.xlu1 %v3435_v45, %s3079_s2  ;;  %s3699_s2 = sld [smem:[#allocation36_spill]] }
 0x8f6   : > { %v1664_v36 = vpop.xlane.xlu0 %1663 }
 0x8f7   : > { %v1665_v37 = vsub.f32 %v1658_v26, %v1664_v36  ;;  %v1886_v26 = vld [vmem:[#allocation12 + $0x88] sm:$0xff]  ;;  %v1877_v36 = vld [vmem:[#allocation12 + $0x40] sm:$0xff] }
 0x8f9   : > { %v1666_v38 = vmul.f32 1.442695, %v1665_v37  ;;  %v1876_v37 = vld [vmem:[#allocation12 + $0x38] sm:$0xff] }
 0x8fa   : > { %v1676_v51 = vpop.permute.xlu0 %1675 }
 0x8fb   : > { %2736 = vpow2.f32 %v1666_v38  ;;  %v1875_v38 = vld [vmem:[#allocation12 + $0x30] sm:$0xff] }
 0x908   : > { %v2737_v39 = vpop.eup %2736 }
 0x909   : > { %v1668_v40 = vsel %vm917_vm2, %v2737_v39, 0.0 }
 0x90a   : > { %1669 = vadd.xlane.f32.xlu1 %v1668_v40  ;;  %v1873_v40 = vld [vmem:[#allocation12 + $0x20] sm:$0xff] }
 0x91b   : > { %1673 = vrot.lane.b32.xlu1 %v3435_v45, %s3080_s11  ;;  %v1502_v45 = vld [vmem:[#allocation11 + $0x40] sm:$0xff] }
 0x95e   : > { %v1420_v41 = vpop.xlane.xlu1 %1419 }
 0x95f   : > { %2738 = vrcp.f32 %v1420_v41  ;;  %v1872_v41 = vld [vmem:[#allocation12 + $0x18] sm:$0xff] }
 0x962   : > { %v1424_v42 = vpop.permute.xlu1 %1423 }
 0x963   : > { %2507 = vmatpush3.msra.mxu1 %v1424_v42  ;;  %v1871_v42 = vld [vmem:[#allocation12 + $0x10] sm:$0xff] }
 0x964   : > { %2511 = vmatprep.subr.mxu1 %v3076_v33 }
 0x96c   : > { %v2739_v43 = vpop.eup %2738 }
 0x96d   : > { %v1422_v44 = vmul.f32 %v2739_v43, %v2735_v34  ;;  %v1879_v34 = vld [vmem:[#allocation12 + $0x50] sm:$0xff]  ;;  %v1870_v43 = vld [vmem:[#allocation12 + $0x8] sm:$0xff] }
 0x96f   : > { %2509 = vmatmul.mubr.msk.f32.vlgmr.msra.gmra.mxu1 %vm917_vm2, %v1422_v44  ;;  %v1869_v44 = vld [vmem:[#allocation12] sm:$0xff] }
 0x970   : > { %2512 = vmatpush3.msra.mxu1 %v1505_v46  ;;  %2519 = vmatprep.mubr.msk.f32.mxu1 %vm3077_vm1, %v3076_v33  ;;  %v2017_v46 = vld [vmem:[#allocation14 + $0xf8] sm:$0xff] }
 0x971   : > { %2513 = vmatprep.subr.mxu1 %v3076_v33  ;;  %2377 = vmatprep.subr.mxu0 %v2017_v46 }
 0x972   : > { %2514 = vmatpush3.msra.mxu1 %v1504_v47  ;;  %v2001_v47 = vld [vmem:[#allocation14 + $0x78] sm:$0xff] }
 0x973   : > { %2515 = vmatprep.subr.mxu1 %v3076_v33 }
 0x974   : > { %2516 = vmatpush3.msra.mxu1 %v1503_v48  ;;  %v2016_v48 = vld [vmem:[#allocation14 + $0xf0] sm:$0xff] }
 0x975   : > { %2517 = vmatprep.subr.mxu1 %v3076_v33 }
 0x976   : > { %2518 = vmatpush3.msra.mxu1 %v1502_v45  ;;  %v2000_v45 = vld [vmem:[#allocation14 + $0x70] sm:$0xff] }
 0x977   : > { %2529 = vmatprep.subr.mxu1 %v3076_v33 }
 0x993   : > { %v1670_v50 = vpop.xlane.xlu1 %1669 }
 0x994   : > { %2740 = vrcp.f32 %v1670_v50  ;;  %v1999_v50 = vld [vmem:[#allocation14 + $0x68] sm:$0xff] }
 0x997   : > { %v1674_v54 = vpop.permute.xlu1 %1673 }
 0x9a1   : > { %v2741_v52 = vpop.eup %2740 }
 0x9a2   : > { %v1672_v56 = vmul.f32 %v2741_v52, %v2737_v39  ;;  %v1874_v39 = vld [vmem:[#allocation12 + $0x28] sm:$0xff]  ;;  %v1998_v52 = vld [vmem:[#allocation14 + $0x60] sm:$0xff] }
 0xa2f   : > { %v1498_v53 = vpop.f32.mrf.mxu1 }
 0xa30   : > { %2520 = vmatmul.mubr.msk.f32.vlgmr.msra.gmra.mxu1 %vm837_vm0, %v1498_v53  ;;  %v2013_v53 = vld [vmem:[#allocation14 + $0xd8] sm:$0xff] }
 0xa31   : > { %2530 = vmatpush3.msra.mxu1 %v1676_v51  ;;  %v2510_v55 = vpop.f32.mrf.mxu1  ;;  %2533 = vmatprep.mubr.msk.f32.mxu1 %vm3077_vm1, %v3076_v33  ;;  %v2014_v51 = vld [vmem:[#allocation14 + $0xe0] sm:$0xff] }
 0xa32   : > { %2531 = vmatprep.subr.mxu1 %v3076_v33  ;;  %v2012_v55 = vld [vmem:[#allocation14 + $0xd0] sm:$0xff] }
 0xa33   : > { %2532 = vmatpush3.msra.mxu1 %v1674_v54  ;;  %v1997_v54 = vld [vmem:[#allocation14 + $0x58] sm:$0xff] }
 0xa34   : > { %2534 = vmatmul.mubr.msk.f32.vlgmr.msra.gmra.mxu1 %vm917_vm2, %v1672_v56  ;;  %1913 = vmatprep.subr.mxu1 %v1900_v8  ;;  %v1996_v56 = vld [vmem:[#allocation14 + $0x50] sm:$0xff] }
 0xa35   : > { %1977 = vmatprep.mubr.f32.mxu1 %v3076_v33  ;;  %v2304_v33 = vld [vmem:[%s3693_s24] ss:$0 sm:$0xff]  ;;  %1914 = vmatpush1.msra.mxu1 %v1899_v9 }
 0xa36   : > { %1915 = vmatprep.subr.mxu1 %v1898_v10  ;;  %v2305_v9 = vld [vmem:[%s3694_s28] ss:$0 sm:$0xff]  ;;  %s2310_s28 = sshll.u32 %s2109_s20, 7 }
 0xa37   : > { %1916 = vmatpush1.msra.mxu1 %v1897_v11  ;;  %v2306_v11 = vld [vmem:[%s3695_s5] ss:$0 sm:$0xff]  ;;  %s2111_s11 = scalar_lea.hbm %s3699_s2, %s2310_s28 }
 0xa38   : > { %1917 = vmatprep.subr.mxu1 %v1896_v12 }
 0xa39   : > { %1918 = vmatpush1.msra.mxu1 %v1895_v13 }
 0xa3a   : > { %1919 = vmatprep.subr.mxu1 %v1894_v14  ;;  %v2005_v14 = vld [vmem:[#allocation14 + $0x98] sm:$0xff] }
 0xa3b   : > { %1920 = vmatpush1.msra.mxu1 %v1893_v15  ;;  %v1989_v15 = vld [vmem:[#allocation14 + $0x18] sm:$0xff] }
 0xa3c   : > { %1921 = vmatprep.subr.mxu1 %v1892_v18  ;;  %v1987_v18 = vld [vmem:[#allocation14 + $0x8] sm:$0xff] }
 0xa3d   : > { %1922 = vmatpush1.msra.mxu1 %v1891_v21  ;;  %v1986_v21 = vld [vmem:[#allocation14] sm:$0xff] }
 0xa3e   : > { %1923 = vmatprep.subr.mxu1 %v1890_v22  ;;  %v1903_v22 = vlaneseq }
 0xa3f   : > { %1924 = vmatpush1.msra.mxu1 %v1889_v23 }
 0xa40   : > { %1925 = vmatprep.subr.mxu1 %v1888_v24  ;;  %v1904_v23 = vshrl.u32 %v1903_v22, 7 }
 0xa41   : > { %1926 = vmatpush1.msra.mxu1 %v1887_v25  ;;  %v1901_v25 = vld [vmem:[%s3697_s8] sm:$0x3]  ;;  %s3081_s8 = smov [#allocation15]  }
 0xa42   : > { %1927 = vmatprep.subr.mxu1 %v1886_v26  ;;  %v1905_v24 = vsub.s32 0, %v1904_v23  ;;  %v1909_v26 = vsub.s32 1, %v1904_v23  ;;  %s2932_s9 = sshll.u32 %s3081_s8, 4  ;;  %s2933_s9 = int_to_ptr.vmem [resolvable:$false] %s2932_s9 }
 0xa43   : > { %1928 = vmatpush1.msra.mxu1 %v1885_v27  ;;  %s2934_s20 = scalar_lea.vmem %s2933_s9, 256  ;;  %p2935_p2 = scmp.lt.s32.totalorder %s2114_s10, %s2933_s9 }
 0xa44   : > { %1929 = vmatprep.subr.mxu1 %v1884_v28  ;;  %v1906_v27 = vrot.slane %v1901_v25, %v1905_v24  ;;  %v1910_v28 = vrot.slane %v1901_v25, %v1909_v26  ;;  %p2936_p1 = scmp.lt.s32.totalorder %s2934_s20, %s2928_s12 }
 0xa45   : > { %1930 = vmatpush1.msra.mxu1 %v1883_v29 }
 0xa46   : > { %1931 = vmatprep.subr.mxu1 %v1882_v30  ;;  %p2937_p4 = por %p2936_p1, %p2935_p2 }
 0xa47   : > { %1932 = vmatpush1.msra.mxu1 %v1881_v31 }
 0xa48   : > { %1933 = vmatprep.subr.mxu1 %v1880_v32  ;;  %p2938_p0 = pnand %p2937_p4, %p2931_p12 }
 0xa49   : > { %1934 = vmatpush1.msra.mxu1 %v1879_v34 }
 0xa4a   : > { %1935 = vmatprep.subr.mxu1 %v1878_v35 }
 0xa4b   : > { %1936 = vmatpush1.msra.mxu1 %v1877_v36 }
 0xa4c   : > { %1937 = vmatprep.subr.mxu1 %v1876_v37  ;;  %v2307_v37 = vld [vmem:[%s3698_s4] ss:$0 sm:$0xff] }
 0xa4d   : > { %1938 = vmatpush1.msra.mxu1 %v1875_v38 }
 0xa4e   : > { %1939 = vmatprep.subr.mxu1 %v1874_v39 }
 0xa4f   : > { %1940 = vmatpush1.msra.mxu1 %v1873_v40 }
 0xa50   : > { %1941 = vmatprep.subr.mxu1 %v1872_v41 }
 0xa51   : > { %1942 = vmatpush1.msra.mxu1 %v1871_v42 }
 0xa52   : > { %1943 = vmatprep.subr.mxu1 %v1870_v43 }
 0xa53   : > { %1944 = vmatpush1.msra.mxu1 %v1869_v44 }
 0xaf0   : > { %v1575_v61 = vpop.f32.mrf.mxu1 }
 0xaf1   : > { %v1579_v62 = vadd.f32 %v1575_v61, %v1327_v60  ;;  %v1994_v60 = vld [vmem:[#allocation14 + $0x40] sm:$0xff]  ;;  %v2009_v61 = vld [vmem:[#allocation14 + $0xb8] sm:$0xff] }
 0xaf2   : > { %v2521_v63 = vpop.f32.mrf.mxu1 }
 0xaf3   : > { %v2008_v63 = vld [vmem:[#allocation14 + $0xb0] sm:$0xff] }
 0xaf4   : > { %v1748_v0 = vpop.f32.mrf.mxu1 }
 0xaf5   : > { %2545 = vmatmul.mubr.msk.f32.vlgmr.msra.gmra.mxu0 %vm837_vm0, %v1748_v0  ;;  %v1992_v0 = vld [vmem:[#allocation14 + $0x30] sm:$0xff] }
 0xaf6   : > { %v2535_v1 = vpop.f32.mrf.mxu1  ;;  %2378 = vmatpush3.msra.mxu0 %v2001_v47 }
 0xaf7   : > { %2379 = vmatprep.subr.mxu0 %v2016_v48  ;;  %v2007_v1 = vld [vmem:[#allocation14 + $0xa8] sm:$0xff] }
 0xaf8   : > { %2380 = vmatpush3.msra.mxu0 %v2000_v45 }
 0xaf9   : > { %2381 = vmatprep.subr.mxu0 %v2015_v49 }
 0xafa   : > { %2382 = vmatpush3.msra.mxu0 %v1999_v50 }
 0xafb   : > { %2383 = vmatprep.subr.mxu0 %v2014_v51 }
 0xafc   : > { %2384 = vmatpush3.msra.mxu0 %v1998_v52 }
 0xafd   : > { %2385 = vmatprep.subr.mxu0 %v2013_v53 }
 0xafe   : > { %2386 = vmatpush3.msra.mxu0 %v1997_v54 }
 0xaff   : > { %2387 = vmatprep.subr.mxu0 %v2012_v55 }
 0xb00   : > { %2388 = vmatpush3.msra.mxu0 %v1996_v56 }
 0xb01   : > { %2389 = vmatprep.subr.mxu0 %v2011_v57 }
 0xb02   : > { %2390 = vmatpush3.msra.mxu0 %v1995_v58 }
 0xb03   : > { %2391 = vmatprep.subr.mxu0 %v2010_v59 }
 0xb04   : > { %2392 = vmatpush3.msra.mxu0 %v1994_v60 }
 0xb05   : > { %2393 = vmatprep.subr.mxu0 %v2009_v61 }
 0xbb5   : > { %v1825_v2 = vpop.f32.mrf.mxu0 }
 0xbb6   : > { %v1829_v4 = vadd.f32 %v1825_v2, %v1579_v62  ;;  %v1993_v62 = vld [vmem:[#allocation14 + $0x38] sm:$0xff]  ;;  %v1991_v2 = vld [vmem:[#allocation14 + $0x28] sm:$0xff] }
 0xbb7   : > { %v2546_v5 = vpop.f32.mrf.mxu0  ;;  %2394 = vmatpush3.msra.mxu0 %v1993_v62 }
 0xbb8   : > { %v1832_v6 = vadd.f32 %v1831_v3, %v1829_v4  ;;  %2395 = vmatprep.subr.mxu0 %v2008_v63  ;;  %v2006_v3 = vld [vmem:[#allocation14 + $0xa0] sm:$0xff] }
 0xbb9   : > { %2396 = vmatpush3.msra.mxu0 %v1992_v0  ;;  %v1990_v4 = vld [vmem:[#allocation14 + $0x20] sm:$0xff] }
 0xbba   : > { %v3547_v7 = vadd.f32 %v2304_v33, %v1832_v6  ;;  %2397 = vmatprep.subr.mxu0 %v2007_v1 }
 0xbbb   : > { %2398 = vmatpush3.msra.mxu0 %v1991_v2 }
 0xbbc   : > { %1843 = vadd.xlane.f32.xlu0 %v3547_v7  ;;  %2399 = vmatprep.subr.mxu0 %v2006_v3 }
 0xbbd   : > { %2400 = vmatpush3.msra.mxu0 %v1990_v4 }
 0xbbe   : > { %2401 = vmatprep.subr.mxu0 %v2005_v14 }
 0xbbf   : > { %2402 = vmatpush3.msra.mxu0 %v1989_v15 }
 0xc45   : > { %v1844_v16 = vpop.xlane.xlu0 %1843 }
 0xc46   : > { %v1846_v17 = vmul.f32 0.0078125, %v1844_v16  ;;  %v2004_v16 = vld [vmem:[#allocation14 + $0x90] sm:$0xff] }
 0xc47   : > { %2403 = vmatprep.subr.mxu0 %v2004_v16 }
 0xc48   : > { %v3551_v19 = vsub.f32 %v3547_v7, %v1846_v17  ;;  %v1988_v17 = vld [vmem:[#allocation14 + $0x10] sm:$0xff] }
 0xc49   : > { %2404 = vmatpush3.msra.mxu0 %v1988_v17 }
 0xc4a   : > { %v1848_v20 = vmul.f32 %v3551_v19, %v3551_v19 }
 0xc4c   : > { %1849 = vadd.xlane.f32.xlu1 %v1848_v20  ;;  %v2003_v20 = vld [vmem:[#allocation14 + $0x88] sm:$0xff] }
 0xc4d   : > { %2405 = vmatprep.subr.mxu0 %v2003_v20 }
 0xc4e   : > { %2406 = vmatpush3.msra.mxu0 %v1987_v18 }
 0xcd5   : > { %v1850_v5 = vpop.xlane.xlu1 %1849 }
 0xcd6   : > { %v1851_v33 = vmul.f32 0.0078125, %v1850_v5 }
 0xcd8   : > { %v1852_v6 = vadd.f32 1e-16, %v1851_v33 }
 0xcda   : > { %2742 = vrsqrt.f32 %v1852_v6 }
 0xce7   : > { %v2743_v8 = vpop.eup %2742 }
 0xce8   : > { %v1854_v10 = vmul.f32 %v2743_v8, %v3551_v19  ;;  %v2002_v19 = vld [vmem:[#allocation14 + $0x80] sm:$0xff] }
 0xce9   : > { %2407 = vmatprep.subr.mxu0 %v2002_v19 }
 0xcea   : > { %v1861_v12 = vmul.f32 %v2305_v9, %v1854_v10  ;;  %2408 = vmatpush3.msra.mxu0 %v1986_v21 }
 0xcec   : > { %v1868_v13 = vadd.f32 %v2306_v11, %v1861_v12 }
 0xcee   : > { %1978 = vmatmul.mubr.f32.vlgmr.msra.gmra.mxu1 %v1868_v13 }
 0xdae   : > { %v1979_v29 = vpop.f32.mrf.mxu1 }
 0xdaf   : > { %v1980_v30 = vadd.f32 %v1979_v29, %v1906_v27 }
 0xdb0   : > { %v1981_v31 = vpop.f32.mrf.mxu1 }
 0xdb1   : > { %v1982_v32 = vadd.f32 %v1981_v31, %v1910_v28  ;;  %v1984_v35 = vmax.f32 %v1980_v30, 0.0 }
 0xdb3   : > { %v1985_v34 = vmax.f32 %v1982_v32, 0.0 }
 0xdb5   : > { %2089 = vmatprep.mubr.f32.mxu0 %v1985_v34 }
 0xdb6   : > { %2090 = vmatmul.mubr.f32.vlgmr.msra.gmra.mxu0 %v1984_v35 }
 0xe76   : > { %v2409_v36 = vpop.f32.mrf.mxu0 }
 0xe78   : > { %v2410_v38 = vpop.f32.mrf.mxu0 }
 0xe79   : > { %v2411_v39 = vadd.f32 %v2410_v38, %v2409_v36 }
 0xe7b   : > { %v2092_v40 = vadd.f32 %v2411_v39, %v2307_v37 }
 0xe7d   : > { %v2095_v41 = vadd.f32 %v2092_v40, %v3547_v7 }
 0xe7f   : > { %2096 = vst [vmem:[%s555_s21] sm:$0xff] %v2095_v41 }
 0xe80   : > { %2941 = shalt.err (!%p2938_p0)
}
 0xe81   : > { %s2942_s24 = scalar_lea.hbm %s2111_s11, 128  ;;  %s2946_s21 = scalar_lea.hbm %s3699_s2, 512 }
 0xe82   : > { %p2943_p3 = scmp.ne.s32.totalorder %s2111_s11, %s2942_s24  ;;  %p2947_p8 = scmp.lt.s32.totalorder %s2111_s11, %s3699_s2 }
 0xe83   : > { %p2948_p13 = scmp.lt.s32.totalorder %s2946_s21, %s2942_s24 }
 0xe84   : > { %p2944_p11 = pnand %p2943_p3, %p3326_p7 }
 0xe85   : > { %p2949_p6 = por %p2948_p13, %p2947_p8 }
 0xe86   : > { %p2945_p5 = pneg %p2944_p11 }
 0xe88   : > { %p2950_p10 = pnand %p2949_p6, %p2945_p5 }
 0xe8a   : > { %2953 = shalt.err (!%p2950_p10)
}
 0xe8b   : > { %2573 = dma.vmem_to_hbm [thread:$0]  (%p3326_p7), %s2114_s10, 128, %s2111_s11, %s2098_s14  }
 0xe8c PF: > { %p2615_p12 = scmp.ge.s32.totalorder %s3060_s18, 2  ;;  %s2125_s28 = sand.u32 1, %s3020_s25  }
 0xe8d   : > { %s2126_s3 = scalar_lea.sflag [#allocation5], %s2125_s28 }
 0xe8e   : > { %p2599_p2 = pnand %p2615_p12, %p3336_p9 }
 0xe90   : > { %p2600_p1 = pneg %p2599_p2 }
 0xe92   : > { %3015 = dma.done.wait (%p2600_p1), %s2126_s3, 128  }
 0xe93   : > { %3017 = vsyncadd (%p2600_p1), %s2126_s3, 4294967168  ;;  %s32_s18 = sadd.s32 1, %s3060_s18   ;;  %s3700_s1 = sld [smem:[#allocation23_spill]] }
 0xe94   : > { %p29_p4 = scmp.ge.s32.totalorder %s32_s18, 6   ;;  %s3701_s25 = smov %s3024_s26 }
 0xe95   : > { %s3702_s26 = smov %s3028_s27  ;;  %s3703_s27 = smov %s3334_s15 }
 0xe96   : > { %s3704_s28 = smov %s3036_s29  ;;  %s3705_s29 = smov %s3040_s30 }
 0xe97   : > { %s3706_s30 = smov %s3331_s13  ;;  %s3707_s14 = smov %s3052_s16 }
 0xe98   : > { %s3708_s15 = smov %s3056_s17  ;;  %s3709_s16 = smov %s3712_s19 }
 0xe99   : > { %s3710_s17 = smov %s3700_s1  ;;  %31 = sbr.rel (!%p29_p4) target bundleno = 26 (0x1a), region = 147 }
 0xe9e   :  { %2131 = vsyncpa [#allocation4], 1 }
 0xe9f   :  { %2133 = vsyncpa [#allocation4 + $0x1], 1 }
 0xea0   :  { %2134 = vsyncpa [#allocation7], 1 }
 0xea1   :  { %2135 = vsyncpa [#allocation10], 1 }
 0xea2   :  { %2136 = vsyncpa [#allocation13], 1 }
 0xea3   :  { %2137 = vsyncpa [#allocation5], 1 }
 0xea4   :  { %2139 = vsyncpa [#allocation5 + $0x1], 1 }

</bundles_post_ra>
